<compile_context>
chip_gen: v6e
topology: v6e:2x2x1
jax: 0.10.0
libtpu: 0.0.40
codegen_flags: <defaults>
</compile_context>

<pallas_src>
import functools

import numpy as np
import jax
import jax.numpy as jnp
from jax.experimental import pallas as pl
from jax.experimental.pallas import tpu as pltpu

_K, _S, _P = 4, 2, 1          # kernel / stride / padding of both convs
_C_HID = 64                    # conv1 output channels
_COUT = 3                      # conv2 output channels
_K1_PAD = 128                  # conv1 im2col K (=48) zero-padded to a full lane width
_COUT_PAD = 128                # lane-dense conv2 output width


# ---------------- fused Pallas kernel (everything on-chip) ----------------

def _generator_fused_kernel(p1_ref, w1_ref, g1_ref, be1_ref, mask_ref,
                            w2_ref, b2_ref, o_ref, y_ref,
                            *, starts, deltas, m2, c_hid):
    # ---- Conv1: one lane-dense MXU matmul.  conv1's bias is intentionally omitted:
    # training-mode BatchNorm's mean subtraction cancels it exactly.
    y = jnp.dot(p1_ref[...], w1_ref[...], preferred_element_type=jnp.float32)

    # ---- BatchNorm2d (training mode, biased batch stats) + ReLU, folded into one FMA.
    # var from E[y^2] - E[y]^2 so y is swept only once for the statistics.
    inv_m = 1.0 / y.shape[0]
    mean = jnp.sum(y, axis=0, keepdims=True) * inv_m
    var = jnp.sum(y * y, axis=0, keepdims=True) * inv_m - mean * mean
    scale = g1_ref[...] * jax.lax.rsqrt(var + 1e-5)
    shift = be1_ref[...] - mean * scale
    y_ref[...] = jnp.maximum(y * scale + shift, 0.0)          # (M1, 64), stays in VMEM

    # ---- Conv2 + bias + Tanh.  y's rows are in space-to-depth (parity-plane) order,
    # so tap (kh, kw) is a contiguous, statically-addressed M2-row window of y;
    # SAME padding is a static (M2, 1) 0/1 row mask, applied only to border taps.
    acc = jnp.zeros(o_ref.shape, jnp.float32)
    for t, (start, (da, db)) in enumerate(zip(starts, deltas)):
        patch = y_ref[start:start + m2, :]                    # (M2, 64) static window
        if da != 0 or db != 0:                                # border tap -> zero pad rows
            patch = patch * mask_ref[t * m2:(t + 1) * m2, :]
        acc = acc + jnp.dot(patch, w2_ref[t * c_hid:(t + 1) * c_hid, :],
                            preferred_element_type=jnp.float32)
    o_ref[...] = jnp.tanh(acc + b2_ref[...])


# ---------------- wrapper-side glue (all inside jit) ----------------

def _im2col_s2d(x_nhwc, k, s, p):
    """Conv1 im2col with rows ordered space-to-depth: (parity_h, parity_w, n, a, b)."""
    x = jnp.pad(x_nhwc, ((0, 0), (p, p), (p, p), (0, 0)))
    n, hp, wp, c = x.shape
    ho = (hp - k) // s + 1
    wo = (wp - k) // s + 1
    cols = []
    for kh in range(k):
        for kw in range(k):
            cols.append(x[:, kh:kh + ho * s:s, kw:kw + wo * s:s, :])
    patches = jnp.stack(cols, axis=3).reshape(n, ho, wo, k * k * c)   # inner (kh,kw,cin)
    planes = [patches[:, r::2, q::2, :].reshape(-1, k * k * c)
              for r in range(2) for q in range(2)]                    # plane id = r*2+q
    return jnp.concatenate(planes, axis=0), (ho, wo)


def _conv2_tap_geometry(n, h1, w1s, k, s, p):
    """Static conv2 geometry over the space-to-depth-ordered y1.

    For k=4, s=2, p=1 every tap (kh, kw) reads one parity plane shifted by
    (da, db) in the halved (a, b) grid, i.e. ONE contiguous M2-row window of y1.
    Returns (starts, deltas, row-mask (k*k*M2, 1) f32, conv2 spatial).
    Built with vectorized numpy (O(k^2)), becomes compile-time constants under jit.
    """
    assert k == 4 and s == 2 and p == 1 and h1 % 2 == 0 and w1s % 2 == 0
    ho2, wo2 = h1 // 2, w1s // 2          # conv2 output spatial == halved grid
    plane = n * ho2 * wo2                 # rows per parity plane == M2
    oh = np.arange(ho2)[:, None]
    ow = np.arange(wo2)[None, :]
    starts, deltas, masks = [], [], []
    for kh in range(k):
        for kw in range(k):
            rh = (kh - p) % 2
            da = (kh - p - rh) // 2
            rw = (kw - p) % 2
            db = (kw - p - rw) // 2
            start = (rh * 2 + rw) * plane + da * wo2 + db
            assert 0 <= start and start + plane <= 4 * plane      # window stays in y1
            valid = ((oh + da >= 0) & (oh + da < ho2) &
                     (ow + db >= 0) & (ow + db < wo2))
            masks.append(np.broadcast_to(valid, (n, ho2, wo2)).reshape(-1))
            starts.append(start)
            deltas.append((da, db))
    mask = np.concatenate(masks).astype(np.float32)[:, None]     # (k*k*M2, 1)
    return tuple(starts), tuple(deltas), mask, (ho2, wo2)


@jax.jit
def generator_forward(x_nchw, params):
    w1, b1, g1, be1, w2, b2 = params
    del b1    # exactly cancelled by training-mode BN mean subtraction (see kernel)
    x = jnp.transpose(x_nchw, (0, 2, 3, 1)).astype(jnp.float32)       # NHWC
    n = x.shape[0]

    # conv1 im2col (rows in space-to-depth order; 48 cols zero-padded to 128 lanes).
    p1, (h1, w1s) = _im2col_s2d(x, _K, _S, _P)
    kdim = p1.shape[1]
    m1 = p1.shape[0]
    p1 = jnp.pad(p1, ((0, 0), (0, _K1_PAD - kdim)))

    # Parameter packing (folded into the jitted graph).
    w1p = jnp.transpose(w1, (2, 3, 1, 0)).reshape(kdim, _C_HID)
    w1p = jnp.pad(w1p, ((0, _K1_PAD - kdim), (0, 0)))                  # (128, 64)
    w2p = jnp.transpose(w2, (2, 3, 1, 0)).reshape(_K * _K * _C_HID, _COUT)
    w2p = jnp.pad(w2p, ((0, 0), (0, _COUT_PAD - _COUT)))               # (1024, 128)
    b2p = jnp.pad(b2.reshape(1, -1), ((0, 0), (0, _COUT_PAD - _COUT)))

    starts, deltas, mask_np, (h2, w2s) = _conv2_tap_geometry(n, h1, w1s, _K, _S, _P)
    m2 = n * h2 * w2s
    mask = jnp.asarray(mask_np)                                        # (16*M2, 1)

    kernel = functools.partial(_generator_fused_kernel, starts=starts,
                               deltas=deltas, m2=m2, c_hid=_C_HID)

    n_taps = _K * _K
    flops = 2 * (m1 * _K1_PAD * _C_HID + n_taps * m2 * _C_HID * _COUT_PAD)
    bytes_acc = 4 * (m1 * _K1_PAD + _K1_PAD * _C_HID + 2 * _C_HID
                     + n_taps * m2 + n_taps * _C_HID * _COUT_PAD
                     + _COUT_PAD + m2 * _COUT_PAD)

    out = pl.pallas_call(
        kernel,
        out_shape=jax.ShapeDtypeStruct((m2, _COUT_PAD), jnp.float32),
        in_specs=[pl.BlockSpec(memory_space=pltpu.MemorySpace.VMEM)] * 7,
        out_specs=pl.BlockSpec(memory_space=pltpu.MemorySpace.VMEM),
        scratch_shapes=[pltpu.VMEM((m1, _C_HID), jnp.float32)],        # y1 (BN+ReLU out)
        cost_estimate=pl.CostEstimate(
            flops=flops,
            transcendentals=m2 * _COUT_PAD + _C_HID,
            bytes_accessed=bytes_acc),
    )(p1, w1p, g1.reshape(1, -1), be1.reshape(1, -1), mask, w2p, b2p)

    y = out[:, :_COUT].reshape(n, h2, w2s, _COUT)
    return jnp.transpose(y, (0, 3, 1, 2))                              # NCHW


# ---------------- pure-JAX reference (for correctness check) ----------------

def _reference(x, params):
    w1, b1, g1, be1, w2, b2 = params
    dn = ('NCHW', 'OIHW', 'NCHW')
    y = jax.lax.conv_general_dilated(x, w1, (2, 2), [(1, 1), (1, 1)],
                                     dimension_numbers=dn) + b1.reshape(1, -1, 1, 1)
    mean = jnp.mean(y, axis=(0, 2, 3), keepdims=True)
    var = jnp.mean((y - mean) ** 2, axis=(0, 2, 3), keepdims=True)
    y = (y - mean) * jax.lax.rsqrt(var + 1e-5)
    y = y * g1.reshape(1, -1, 1, 1) + be1.reshape(1, -1, 1, 1)
    y = jnp.maximum(y, 0.0)
    y = jax.lax.conv_general_dilated(y, w2, (2, 2), [(1, 1), (1, 1)],
                                     dimension_numbers=dn) + b2.reshape(1, -1, 1, 1)
    return jnp.tanh(y)


if __name__ == "__main__":
    key = jax.random.PRNGKey(0)
    k_x, k_w1, k_b1, k_g, k_be, k_w2, k_b2 = jax.random.split(key, 7)

    # Deterministic synthetic parameters (shapes from the module __init__)
    w1 = 0.05 * jax.random.normal(k_w1, (64, 3, 4, 4), jnp.float32)
    b1 = 0.05 * jax.random.normal(k_b1, (64,), jnp.float32)
    g1 = 1.0 + 0.1 * jax.random.normal(k_g, (64,), jnp.float32)   # BN gamma
    be1 = 0.1 * jax.random.normal(k_be, (64,), jnp.float32)       # BN beta
    w2 = 0.05 * jax.random.normal(k_w2, (3, 64, 4, 4), jnp.float32)
    b2 = 0.05 * jax.random.normal(k_b2, (3,), jnp.float32)
    params = (w1, b1, g1, be1, w2, b2)

    x = jax.random.normal(k_x, (2, 3, 16, 16), jnp.float32)  # NCHW like PyTorch

    out = jax.block_until_ready(generator_forward(x, params))
    ref = jax.block_until_ready(_reference(x, params))

    assert out.shape == (2, 3, 4, 4), out.shape
    assert jnp.allclose(out, ref, rtol=1e-4, atol=1e-4), \
        float(jnp.max(jnp.abs(out - ref)))
    print("KERNEL_OK")
</pallas_src>

<mosaic_0001>
module attributes {stable_mosaic.version = 11 : i64} {
  func.func @_generator_fused_kernel(%arg0: memref<128x128xf32, #tpu.memory_space<vmem>>, %arg1: memref<128x64xf32, #tpu.memory_space<vmem>>, %arg2: memref<1x64xf32, #tpu.memory_space<vmem>>, %arg3: memref<1x64xf32, #tpu.memory_space<vmem>>, %arg4: memref<512x1xf32, #tpu.memory_space<vmem>>, %arg5: memref<1024x128xf32, #tpu.memory_space<vmem>>, %arg6: memref<1x128xf32, #tpu.memory_space<vmem>>, %arg7: memref<32x128xf32, #tpu.memory_space<vmem>>, %arg8: memref<128x64xf32, #tpu.memory_space<vmem>>) attributes {dimension_semantics = [], scalar_prefetch = 0 : i64, scratch_operands = 1 : i64, tpu.core_type = #tpu.core_type<tc>} {
    %c0 = arith.constant 0 : index
    %c0_0 = arith.constant 0 : index
    %0 = vector.load %arg0[%c0, %c0_0] : memref<128x128xf32, #tpu.memory_space<vmem>>, vector<128x128xf32>
    %c0_1 = arith.constant 0 : index
    %c0_2 = arith.constant 0 : index
    %1 = vector.load %arg1[%c0_1, %c0_2] : memref<128x64xf32, #tpu.memory_space<vmem>>, vector<128x64xf32>
    %cst = arith.constant dense<0.000000e+00> : vector<128x64xf32>
    %2 = tpu.matmul %0, %1, %cst {dimension_numbers = #tpu.dot_dimension_numbers<[1], [0], [0], [1], [0, 0, 1, 1], [], []>} : vector<128x128xf32>, vector<128x64xf32>, vector<128x64xf32> -> vector<128x64xf32>
    %cst_3 = arith.constant dense<0.000000e+00> : vector<64xf32>
    %3 = vector.multi_reduction <add>, %2, %cst_3 [0] : vector<128x64xf32> to vector<64xf32>
    %4 = vector.shape_cast %3 : vector<64xf32> to vector<1x64xf32>
    %cst_4 = arith.constant 7.812500e-03 : f32
    %5 = vector.broadcast %cst_4 : f32 to vector<1x64xf32>
    %6 = arith.mulf %4, %5 : vector<1x64xf32>
    %7 = arith.mulf %2, %2 : vector<128x64xf32>
    %cst_5 = arith.constant dense<0.000000e+00> : vector<64xf32>
    %8 = vector.multi_reduction <add>, %7, %cst_5 [0] : vector<128x64xf32> to vector<64xf32>
    %9 = vector.shape_cast %8 : vector<64xf32> to vector<1x64xf32>
    %cst_6 = arith.constant 7.812500e-03 : f32
    %10 = vector.broadcast %cst_6 : f32 to vector<1x64xf32>
    %11 = arith.mulf %9, %10 : vector<1x64xf32>
    %12 = arith.mulf %6, %6 : vector<1x64xf32>
    %13 = arith.subf %11, %12 : vector<1x64xf32>
    %c0_7 = arith.constant 0 : index
    %c0_8 = arith.constant 0 : index
    %14 = vector.load %arg2[%c0_7, %c0_8] : memref<1x64xf32, #tpu.memory_space<vmem>>, vector<1x64xf32>
    %cst_9 = arith.constant 9.99999974E-6 : f32
    %15 = vector.broadcast %cst_9 : f32 to vector<1x64xf32>
    %16 = arith.addf %13, %15 : vector<1x64xf32>
    %17 = math.rsqrt %16 : vector<1x64xf32>
    %18 = arith.mulf %14, %17 : vector<1x64xf32>
    %c0_10 = arith.constant 0 : index
    %c0_11 = arith.constant 0 : index
    %19 = vector.load %arg3[%c0_10, %c0_11] : memref<1x64xf32, #tpu.memory_space<vmem>>, vector<1x64xf32>
    %20 = arith.mulf %6, %18 : vector<1x64xf32>
    %21 = arith.subf %19, %20 : vector<1x64xf32>
    %22 = vector.broadcast %18 : vector<1x64xf32> to vector<128x64xf32>
    %23 = arith.mulf %2, %22 : vector<128x64xf32>
    %24 = vector.broadcast %21 : vector<1x64xf32> to vector<128x64xf32>
    %25 = arith.addf %23, %24 : vector<128x64xf32>
    %cst_12 = arith.constant 0.000000e+00 : f32
    %26 = vector.broadcast %cst_12 : f32 to vector<128x64xf32>
    %27 = arith.maximumf %25, %26 : vector<128x64xf32>
    %c0_13 = arith.constant 0 : index
    %c0_14 = arith.constant 0 : index
    %28 = vector.load %arg8[%c0_13, %c0_14] : memref<128x64xf32, #tpu.memory_space<vmem>>, vector<128x64xf32>
    tpu.vector_store %arg8[%c0_13, %c0_14], %27 {strides = array<i32>} : memref<128x64xf32, #tpu.memory_space<vmem>>, vector<128x64xf32>,
    %cst_15 = arith.constant 0.000000e+00 : f32
    %29 = vector.broadcast %cst_15 : f32 to vector<32x128xf32>
    %c91 = arith.constant 91 : index
    %c0_16 = arith.constant 0 : index
    %30 = vector.load %arg8[%c91, %c0_16] : memref<128x64xf32, #tpu.memory_space<vmem>>, vector<32x64xf32>
    %c0_17 = arith.constant 0 : index
    %c0_18 = arith.constant 0 : index
    %31 = vector.load %arg4[%c0_17, %c0_18] : memref<512x1xf32, #tpu.memory_space<vmem>>, vector<32x1xf32>
    %32 = vector.broadcast %31 : vector<32x1xf32> to vector<32x64xf32>
    %33 = arith.mulf %30, %32 : vector<32x64xf32>
    %c0_19 = arith.constant 0 : index
    %c0_20 = arith.constant 0 : index
    %34 = vector.load %arg5[%c0_19, %c0_20] : memref<1024x128xf32, #tpu.memory_space<vmem>>, vector<64x128xf32>
    %cst_21 = arith.constant dense<0.000000e+00> : vector<32x128xf32>
    %35 = tpu.matmul %33, %34, %cst_21 {dimension_numbers = #tpu.dot_dimension_numbers<[1], [0], [0], [1], [0, 0, 1, 1], [], []>} : vector<32x64xf32>, vector<64x128xf32>, vector<32x128xf32> -> vector<32x128xf32>
    %36 = arith.addf %29, %35 : vector<32x128xf32>
    %c60 = arith.constant 60 : index
    %c0_22 = arith.constant 0 : index
    %37 = vector.load %arg8[%c60, %c0_22] : memref<128x64xf32, #tpu.memory_space<vmem>>, vector<32x64xf32>
    %c32 = arith.constant 32 : index
    %c0_23 = arith.constant 0 : index
    %38 = vector.load %arg4[%c32, %c0_23] : memref<512x1xf32, #tpu.memory_space<vmem>>, vector<32x1xf32>
    %39 = vector.broadcast %38 : vector<32x1xf32> to vector<32x64xf32>
    %40 = arith.mulf %37, %39 : vector<32x64xf32>
    %c64 = arith.constant 64 : index
    %c0_24 = arith.constant 0 : index
    %41 = vector.load %arg5[%c64, %c0_24] : memref<1024x128xf32, #tpu.memory_space<vmem>>, vector<64x128xf32>
    %cst_25 = arith.constant dense<0.000000e+00> : vector<32x128xf32>
    %42 = tpu.matmul %40, %41, %cst_25 {dimension_numbers = #tpu.dot_dimension_numbers<[1], [0], [0], [1], [0, 0, 1, 1], [], []>} : vector<32x64xf32>, vector<64x128xf32>, vector<32x128xf32> -> vector<32x128xf32>
    %43 = arith.addf %36, %42 : vector<32x128xf32>
    %c92 = arith.constant 92 : index
    %c0_26 = arith.constant 0 : index
    %44 = vector.load %arg8[%c92, %c0_26] : memref<128x64xf32, #tpu.memory_space<vmem>>, vector<32x64xf32>
    %c64_27 = arith.constant 64 : index
    %c0_28 = arith.constant 0 : index
    %45 = vector.load %arg4[%c64_27, %c0_28] : memref<512x1xf32, #tpu.memory_space<vmem>>, vector<32x1xf32>
    %46 = vector.broadcast %45 : vector<32x1xf32> to vector<32x64xf32>
    %47 = arith.mulf %44, %46 : vector<32x64xf32>
    %c128 = arith.constant 128 : index
    %c0_29 = arith.constant 0 : index
    %48 = vector.load %arg5[%c128, %c0_29] : memref<1024x128xf32, #tpu.memory_space<vmem>>, vector<64x128xf32>
    %cst_30 = arith.constant dense<0.000000e+00> : vector<32x128xf32>
    %49 = tpu.matmul %47, %48, %cst_30 {dimension_numbers = #tpu.dot_dimension_numbers<[1], [0], [0], [1], [0, 0, 1, 1], [], []>} : vector<32x64xf32>, vector<64x128xf32>, vector<32x128xf32> -> vector<32x128xf32>
    %50 = arith.addf %43, %49 : vector<32x128xf32>
    %c61 = arith.constant 61 : index
    %c0_31 = arith.constant 0 : index
    %51 = vector.load %arg8[%c61, %c0_31] : memref<128x64xf32, #tpu.memory_space<vmem>>, vector<32x64xf32>
    %c96 = arith.constant 96 : index
    %c0_32 = arith.constant 0 : index
    %52 = vector.load %arg4[%c96, %c0_32] : memref<512x1xf32, #tpu.memory_space<vmem>>, vector<32x1xf32>
    %53 = vector.broadcast %52 : vector<32x1xf32> to vector<32x64xf32>
    %54 = arith.mulf %51, %53 : vector<32x64xf32>
    %c192 = arith.constant 192 : index
    %c0_33 = arith.constant 0 : index
    %55 = vector.load %arg5[%c192, %c0_33] : memref<1024x128xf32, #tpu.memory_space<vmem>>, vector<64x128xf32>
    %cst_34 = arith.constant dense<0.000000e+00> : vector<32x128xf32>
    %56 = tpu.matmul %54, %55, %cst_34 {dimension_numbers = #tpu.dot_dimension_numbers<[1], [0], [0], [1], [0, 0, 1, 1], [], []>} : vector<32x64xf32>, vector<64x128xf32>, vector<32x128xf32> -> vector<32x128xf32>
    %57 = arith.addf %50, %56 : vector<32x128xf32>
    %c31 = arith.constant 31 : index
    %c0_35 = arith.constant 0 : index
    %58 = vector.load %arg8[%c31, %c0_35] : memref<128x64xf32, #tpu.memory_space<vmem>>, vector<32x64xf32>
    %c128_36 = arith.constant 128 : index
    %c0_37 = arith.constant 0 : index
    %59 = vector.load %arg4[%c128_36, %c0_37] : memref<512x1xf32, #tpu.memory_space<vmem>>, vector<32x1xf32>
    %60 = vector.broadcast %59 : vector<32x1xf32> to vector<32x64xf32>
    %61 = arith.mulf %58, %60 : vector<32x64xf32>
    %c256 = arith.constant 256 : index
    %c0_38 = arith.constant 0 : index
    %62 = vector.load %arg5[%c256, %c0_38] : memref<1024x128xf32, #tpu.memory_space<vmem>>, vector<64x128xf32>
    %cst_39 = arith.constant dense<0.000000e+00> : vector<32x128xf32>
    %63 = tpu.matmul %61, %62, %cst_39 {dimension_numbers = #tpu.dot_dimension_numbers<[1], [0], [0], [1], [0, 0, 1, 1], [], []>} : vector<32x64xf32>, vector<64x128xf32>, vector<32x128xf32> -> vector<32x128xf32>
    %64 = arith.addf %57, %63 : vector<32x128xf32>
    %c0_40 = arith.constant 0 : index
    %c0_41 = arith.constant 0 : index
    %65 = vector.load %arg8[%c0_40, %c0_41] : memref<128x64xf32, #tpu.memory_space<vmem>>, vector<32x64xf32>
    %c320 = arith.constant 320 : index
    %c0_42 = arith.constant 0 : index
    %66 = vector.load %arg5[%c320, %c0_42] : memref<1024x128xf32, #tpu.memory_space<vmem>>, vector<64x128xf32>
    %cst_43 = arith.constant dense<0.000000e+00> : vector<32x128xf32>
    %67 = tpu.matmul %65, %66, %cst_43 {dimension_numbers = #tpu.dot_dimension_numbers<[1], [0], [0], [1], [0, 0, 1, 1], [], []>} : vector<32x64xf32>, vector<64x128xf32>, vector<32x128xf32> -> vector<32x128xf32>
    %68 = arith.addf %64, %67 : vector<32x128xf32>
    %c32_44 = arith.constant 32 : index
    %c0_45 = arith.constant 0 : index
    %69 = vector.load %arg8[%c32_44, %c0_45] : memref<128x64xf32, #tpu.memory_space<vmem>>, vector<32x64xf32>
    %c384 = arith.constant 384 : index
    %c0_46 = arith.constant 0 : index
    %70 = vector.load %arg5[%c384, %c0_46] : memref<1024x128xf32, #tpu.memory_space<vmem>>, vector<64x128xf32>
    %cst_47 = arith.constant dense<0.000000e+00> : vector<32x128xf32>
    %71 = tpu.matmul %69, %70, %cst_47 {dimension_numbers = #tpu.dot_dimension_numbers<[1], [0], [0], [1], [0, 0, 1, 1], [], []>} : vector<32x64xf32>, vector<64x128xf32>, vector<32x128xf32> -> vector<32x128xf32>
    %72 = arith.addf %68, %71 : vector<32x128xf32>
    %c1 = arith.constant 1 : index
    %c0_48 = arith.constant 0 : index
    %73 = vector.load %arg8[%c1, %c0_48] : memref<128x64xf32, #tpu.memory_space<vmem>>, vector<32x64xf32>
    %c224 = arith.constant 224 : index
    %c0_49 = arith.constant 0 : index
    %74 = vector.load %arg4[%c224, %c0_49] : memref<512x1xf32, #tpu.memory_space<vmem>>, vector<32x1xf32>
    %75 = vector.broadcast %74 : vector<32x1xf32> to vector<32x64xf32>
    %76 = arith.mulf %73, %75 : vector<32x64xf32>
    %c448 = arith.constant 448 : index
    %c0_50 = arith.constant 0 : index
    %77 = vector.load %arg5[%c448, %c0_50] : memref<1024x128xf32, #tpu.memory_space<vmem>>, vector<64x128xf32>
    %cst_51 = arith.constant dense<0.000000e+00> : vector<32x128xf32>
    %78 = tpu.matmul %76, %77, %cst_51 {dimension_numbers = #tpu.dot_dimension_numbers<[1], [0], [0], [1], [0, 0, 1, 1], [], []>} : vector<32x64xf32>, vector<64x128xf32>, vector<32x128xf32> -> vector<32x128xf32>
    %79 = arith.addf %72, %78 : vector<32x128xf32>
    %c95 = arith.constant 95 : index
    %c0_52 = arith.constant 0 : index
    %80 = vector.load %arg8[%c95, %c0_52] : memref<128x64xf32, #tpu.memory_space<vmem>>, vector<32x64xf32>
    %c256_53 = arith.constant 256 : index
    %c0_54 = arith.constant 0 : index
    %81 = vector.load %arg4[%c256_53, %c0_54] : memref<512x1xf32, #tpu.memory_space<vmem>>, vector<32x1xf32>
    %82 = vector.broadcast %81 : vector<32x1xf32> to vector<32x64xf32>
    %83 = arith.mulf %80, %82 : vector<32x64xf32>
    %c512 = arith.constant 512 : index
    %c0_55 = arith.constant 0 : index
    %84 = vector.load %arg5[%c512, %c0_55] : memref<1024x128xf32, #tpu.memory_space<vmem>>, vector<64x128xf32>
    %cst_56 = arith.constant dense<0.000000e+00> : vector<32x128xf32>
    %85 = tpu.matmul %83, %84, %cst_56 {dimension_numbers = #tpu.dot_dimension_numbers<[1], [0], [0], [1], [0, 0, 1, 1], [], []>} : vector<32x64xf32>, vector<64x128xf32>, vector<32x128xf32> -> vector<32x128xf32>
    %86 = arith.addf %79, %85 : vector<32x128xf32>
    %c64_57 = arith.constant 64 : index
    %c0_58 = arith.constant 0 : index
    %87 = vector.load %arg8[%c64_57, %c0_58] : memref<128x64xf32, #tpu.memory_space<vmem>>, vector<32x64xf32>
    %c576 = arith.constant 576 : index
    %c0_59 = arith.constant 0 : index
    %88 = vector.load %arg5[%c576, %c0_59] : memref<1024x128xf32, #tpu.memory_space<vmem>>, vector<64x128xf32>
    %cst_60 = arith.constant dense<0.000000e+00> : vector<32x128xf32>
    %89 = tpu.matmul %87, %88, %cst_60 {dimension_numbers = #tpu.dot_dimension_numbers<[1], [0], [0], [1], [0, 0, 1, 1], [], []>} : vector<32x64xf32>, vector<64x128xf32>, vector<32x128xf32> -> vector<32x128xf32>
    %90 = arith.addf %86, %89 : vector<32x128xf32>
    %c96_61 = arith.constant 96 : index
    %c0_62 = arith.constant 0 : index
    %91 = vector.load %arg8[%c96_61, %c0_62] : memref<128x64xf32, #tpu.memory_space<vmem>>, vector<32x64xf32>
    %c640 = arith.constant 640 : index
    %c0_63 = arith.constant 0 : index
    %92 = vector.load %arg5[%c640, %c0_63] : memref<1024x128xf32, #tpu.memory_space<vmem>>, vector<64x128xf32>
    %cst_64 = arith.constant dense<0.000000e+00> : vector<32x128xf32>
    %93 = tpu.matmul %91, %92, %cst_64 {dimension_numbers = #tpu.dot_dimension_numbers<[1], [0], [0], [1], [0, 0, 1, 1], [], []>} : vector<32x64xf32>, vector<64x128xf32>, vector<32x128xf32> -> vector<32x128xf32>
    %94 = arith.addf %90, %93 : vector<32x128xf32>
    %c65 = arith.constant 65 : index
    %c0_65 = arith.constant 0 : index
    %95 = vector.load %arg8[%c65, %c0_65] : memref<128x64xf32, #tpu.memory_space<vmem>>, vector<32x64xf32>
    %c352 = arith.constant 352 : index
    %c0_66 = arith.constant 0 : index
    %96 = vector.load %arg4[%c352, %c0_66] : memref<512x1xf32, #tpu.memory_space<vmem>>, vector<32x1xf32>
    %97 = vector.broadcast %96 : vector<32x1xf32> to vector<32x64xf32>
    %98 = arith.mulf %95, %97 : vector<32x64xf32>
    %c704 = arith.constant 704 : index
    %c0_67 = arith.constant 0 : index
    %99 = vector.load %arg5[%c704, %c0_67] : memref<1024x128xf32, #tpu.memory_space<vmem>>, vector<64x128xf32>
    %cst_68 = arith.constant dense<0.000000e+00> : vector<32x128xf32>
    %100 = tpu.matmul %98, %99, %cst_68 {dimension_numbers = #tpu.dot_dimension_numbers<[1], [0], [0], [1], [0, 0, 1, 1], [], []>} : vector<32x64xf32>, vector<64x128xf32>, vector<32x128xf32> -> vector<32x128xf32>
    %101 = arith.addf %94, %100 : vector<32x128xf32>
    %c35 = arith.constant 35 : index
    %c0_69 = arith.constant 0 : index
    %102 = vector.load %arg8[%c35, %c0_69] : memref<128x64xf32, #tpu.memory_space<vmem>>, vector<32x64xf32>
    %c384_70 = arith.constant 384 : index
    %c0_71 = arith.constant 0 : index
    %103 = vector.load %arg4[%c384_70, %c0_71] : memref<512x1xf32, #tpu.memory_space<vmem>>, vector<32x1xf32>
    %104 = vector.broadcast %103 : vector<32x1xf32> to vector<32x64xf32>
    %105 = arith.mulf %102, %104 : vector<32x64xf32>
    %c768 = arith.constant 768 : index
    %c0_72 = arith.constant 0 : index
    %106 = vector.load %arg5[%c768, %c0_72] : memref<1024x128xf32, #tpu.memory_space<vmem>>, vector<64x128xf32>
    %cst_73 = arith.constant dense<0.000000e+00> : vector<32x128xf32>
    %107 = tpu.matmul %105, %106, %cst_73 {dimension_numbers = #tpu.dot_dimension_numbers<[1], [0], [0], [1], [0, 0, 1, 1], [], []>} : vector<32x64xf32>, vector<64x128xf32>, vector<32x128xf32> -> vector<32x128xf32>
    %108 = arith.addf %101, %107 : vector<32x128xf32>
    %c4 = arith.constant 4 : index
    %c0_74 = arith.constant 0 : index
    %109 = vector.load %arg8[%c4, %c0_74] : memref<128x64xf32, #tpu.memory_space<vmem>>, vector<32x64xf32>
    %c416 = arith.constant 416 : index
    %c0_75 = arith.constant 0 : index
    %110 = vector.load %arg4[%c416, %c0_75] : memref<512x1xf32, #tpu.memory_space<vmem>>, vector<32x1xf32>
    %111 = vector.broadcast %110 : vector<32x1xf32> to vector<32x64xf32>
    %112 = arith.mulf %109, %111 : vector<32x64xf32>
    %c832 = arith.constant 832 : index
    %c0_76 = arith.constant 0 : index
    %113 = vector.load %arg5[%c832, %c0_76] : memref<1024x128xf32, #tpu.memory_space<vmem>>, vector<64x128xf32>
    %cst_77 = arith.constant dense<0.000000e+00> : vector<32x128xf32>
    %114 = tpu.matmul %112, %113, %cst_77 {dimension_numbers = #tpu.dot_dimension_numbers<[1], [0], [0], [1], [0, 0, 1, 1], [], []>} : vector<32x64xf32>, vector<64x128xf32>, vector<32x128xf32> -> vector<32x128xf32>
    %115 = arith.addf %108, %114 : vector<32x128xf32>
    %c36 = arith.constant 36 : index
    %c0_78 = arith.constant 0 : index
    %116 = vector.load %arg8[%c36, %c0_78] : memref<128x64xf32, #tpu.memory_space<vmem>>, vector<32x64xf32>
    %c448_79 = arith.constant 448 : index
    %c0_80 = arith.constant 0 : index
    %117 = vector.load %arg4[%c448_79, %c0_80] : memref<512x1xf32, #tpu.memory_space<vmem>>, vector<32x1xf32>
    %118 = vector.broadcast %117 : vector<32x1xf32> to vector<32x64xf32>
    %119 = arith.mulf %116, %118 : vector<32x64xf32>
    %c896 = arith.constant 896 : index
    %c0_81 = arith.constant 0 : index
    %120 = vector.load %arg5[%c896, %c0_81] : memref<1024x128xf32, #tpu.memory_space<vmem>>, vector<64x128xf32>
    %cst_82 = arith.constant dense<0.000000e+00> : vector<32x128xf32>
    %121 = tpu.matmul %119, %120, %cst_82 {dimension_numbers = #tpu.dot_dimension_numbers<[1], [0], [0], [1], [0, 0, 1, 1], [], []>} : vector<32x64xf32>, vector<64x128xf32>, vector<32x128xf32> -> vector<32x128xf32>
    %122 = arith.addf %115, %121 : vector<32x128xf32>
    %c5 = arith.constant 5 : index
    %c0_83 = arith.constant 0 : index
    %123 = vector.load %arg8[%c5, %c0_83] : memref<128x64xf32, #tpu.memory_space<vmem>>, vector<32x64xf32>
    %c480 = arith.constant 480 : index
    %c0_84 = arith.constant 0 : index
    %124 = vector.load %arg4[%c480, %c0_84] : memref<512x1xf32, #tpu.memory_space<vmem>>, vector<32x1xf32>
    %125 = vector.broadcast %124 : vector<32x1xf32> to vector<32x64xf32>
    %126 = arith.mulf %123, %125 : vector<32x64xf32>
    %c960 = arith.constant 960 : index
    %c0_85 = arith.constant 0 : index
    %127 = vector.load %arg5[%c960, %c0_85] : memref<1024x128xf32, #tpu.memory_space<vmem>>, vector<64x128xf32>
    %cst_86 = arith.constant dense<0.000000e+00> : vector<32x128xf32>
    %128 = tpu.matmul %126, %127, %cst_86 {dimension_numbers = #tpu.dot_dimension_numbers<[1], [0], [0], [1], [0, 0, 1, 1], [], []>} : vector<32x64xf32>, vector<64x128xf32>, vector<32x128xf32> -> vector<32x128xf32>
    %129 = arith.addf %122, %128 : vector<32x128xf32>
    %c0_87 = arith.constant 0 : index
    %c0_88 = arith.constant 0 : index
    %130 = vector.load %arg6[%c0_87, %c0_88] : memref<1x128xf32, #tpu.memory_space<vmem>>, vector<1x128xf32>
    %131 = vector.broadcast %130 : vector<1x128xf32> to vector<32x128xf32>
    %132 = arith.addf %129, %131 : vector<32x128xf32>
    %133 = math.tanh %132 : vector<32x128xf32>
    %c0_89 = arith.constant 0 : index
    %c0_90 = arith.constant 0 : index
    %134 = vector.load %arg7[%c0_89, %c0_90] : memref<32x128xf32, #tpu.memory_space<vmem>>, vector<32x128xf32>
    tpu.vector_store %arg7[%c0_89, %c0_90], %133 {strides = array<i32>} : memref<32x128xf32, #tpu.memory_space<vmem>>, vector<32x128xf32>,
    return
  }
}

</mosaic_0001>

<bundles_post_ra>
// kernel: generator_forward.1
= control target key start
LH: loop header
LB: loop body
LE: loop exit
PB: predicated region body
PF: predicated region fallthrough
CT: control target
= control target key end

     0   :  { %v3267_v2 = vmov 0   ;;  %vm203_vm0 = vcmask 523264   ;;  %s4232_s1 = inlined_call_operand.vmem [shape: f32[128,64], index: 1, kind: input, shape index: {}]   ;;  %s4233_s0 = inlined_call_operand.vmem [shape: f32[128,128], index: 0, kind: input, shape index: {}]   ;;  %s4234_s4 = inlined_call_operand.vmem [shape: f32[512,1], index: 4, kind: input, shape index: {}]   ;;  %s4235_s5 = inlined_call_operand.vmem [shape: f32[1024,128], index: 5, kind: input, shape index: {}]   ;;  %s4236_s2 = inlined_call_operand.vmem [shape: f32[1,64], index: 2, kind: input, shape index: {}]   ;;  %s4237_s3 = inlined_call_operand.vmem [shape: f32[1,64], index: 3, kind: input, shape index: {}]   ;;  %s4238_s6 = inlined_call_operand.vmem [shape: f32[1,128], index: 6, kind: input, shape index: {}]   ;;  %s4239_s7 = inlined_call_operand.vmem [shape: f32[32,128], index: 7, kind: output, shape index: {}]  }
   0x1   :  { %v57_v0 = vld [vmem:[%s4232_s1 + $0x78] sm:$0xff]  ;;  %v56_v1 = vld [vmem:[%s4232_s1 + $0x70] sm:$0xff]  ;;  %3254 = vset.pattern.permute.xlu0 %v3267_v2  ;;  %3255 = vset.pattern.permute.xlu1 %v3267_v2  ;;  %v55_v3 = vld [vmem:[%s4232_s1 + $0x68] sm:$0xff] }
   0x2   :  { %2829 = vmatprep.subr.mxu0 %v57_v0  ;;  %v54_v4 = vld [vmem:[%s4232_s1 + $0x60] sm:$0xff]  ;;  %v53_v6 = vld [vmem:[%s4232_s1 + $0x58] sm:$0xff]  ;;  %v52_v7 = vld [vmem:[%s4232_s1 + $0x50] sm:$0xff] }
   0x3   :  { %2830 = vmatpush3.msra.mxu0 %v57_v0  ;;  %v26_v5 = vld [vmem:[%s4233_s0] sm:$0xff]  ;;  %v51_v8 = vld [vmem:[%s4232_s1 + $0x48] sm:$0xff]  ;;  %v427_v10 = vld [vmem:[%s4234_s4 + $0x30] sm:$0xff] }
   0x4   :  { %2831 = vmatprep.subr.mxu0 %v56_v1  ;;  %2861 = vmatprep.mubr.f32.mxu0 %v26_v5  ;;  %v425_v9 = vld [vmem:[%s4234_s4 + $0x20] sm:$0xff]  ;;  %v426_v12 = vld [vmem:[%s4234_s4 + $0x28] sm:$0xff]  ;;  %v428_v13 = vld [vmem:[%s4234_s4 + $0x38] sm:$0xff] }
   0x5   :  { %2832 = vmatpush3.msra.mxu0 %v56_v1  ;;  %431 = vperm.xlu0 %3254, %v425_v9   ;;  %v50_v11 = vld [vmem:[%s4232_s1 + $0x40] sm:$0xff]  ;;  %v49_v14 = vld [vmem:[%s4232_s1 + $0x38] sm:$0xff]  ;;  %v48_v15 = vld [vmem:[%s4232_s1 + $0x30] sm:$0xff] }
   0x6   :  { %2833 = vmatprep.subr.mxu0 %v55_v3  ;;  %441 = vperm.xlu1 %3255, %v427_v10   ;;  %v385_v16 = vld [vmem:[%s4234_s4] sm:$0xff]  ;;  %v386_v17 = vld [vmem:[%s4234_s4 + $0x8] sm:$0xff]  ;;  %v387_v20 = vld [vmem:[%s4234_s4 + $0x10] sm:$0xff] }
   0x7   :  { %2834 = vmatpush3.msra.mxu0 %v55_v3  ;;  %v47_v18 = vld [vmem:[%s4232_s1 + $0x28] sm:$0xff]  ;;  %v46_v19 = vld [vmem:[%s4232_s1 + $0x20] sm:$0xff]  ;;  %v388_v21 = vld [vmem:[%s4234_s4 + $0x18] sm:$0xff] }
   0x8   :  { %2835 = vmatprep.subr.mxu0 %v54_v4  ;;  %v45_v22 = vld [vmem:[%s4232_s1 + $0x18] sm:$0xff]  ;;  %v44_v23 = vld [vmem:[%s4232_s1 + $0x10] sm:$0xff]  ;;  %v659_v24 = vld [vmem:[%s4234_s4 + $0x40] sm:$0xff] }
   0x9   :  { %2836 = vmatpush3.msra.mxu0 %v54_v4  ;;  %436 = vperm.xlu0 %3254, %v426_v12   ;;  %v660_v25 = vld [vmem:[%s4234_s4 + $0x48] sm:$0xff]  ;;  %v42_v27 = vld [vmem:[%s4232_s1] sm:$0xff]  ;;  %v661_v28 = vld [vmem:[%s4234_s4 + $0x50] sm:$0xff] }
   0xa   :  { %2837 = vmatprep.subr.mxu0 %v53_v6  ;;  %446 = vperm.xlu1 %3255, %v428_v13   ;;  %v43_v26 = vld [vmem:[%s4232_s1 + $0x8] sm:$0xff]  ;;  %v662_v29 = vld [vmem:[%s4234_s4 + $0x58] sm:$0xff]  ;;  %v28_v31 = vld [vmem:[%s4233_s0 + $0x10] sm:$0xff] }
   0xb   :  { %2838 = vmatpush3.msra.mxu0 %v53_v6  ;;  %v27_v30 = vld [vmem:[%s4233_s0 + $0x8] sm:$0xff]  ;;  %v800_v32 = vld [vmem:[%s4234_s4 + $0x60] sm:$0xff]  ;;  %v29_v34 = vld [vmem:[%s4233_s0 + $0x18] sm:$0xff] }
   0xc   :  { %2839 = vmatprep.subr.mxu0 %v52_v7  ;;  %v941_v33 = vld [vmem:[%s4234_s4 + $0x80] sm:$0xff]  ;;  %v801_v36 = vld [vmem:[%s4234_s4 + $0x68] sm:$0xff]  ;;  %v32_v39 = vld [vmem:[%s4233_s0 + $0x30] sm:$0xff] }
   0xd   :  { %2840 = vmatpush3.msra.mxu0 %v52_v7  ;;  %391 = vperm.xlu0 %3254, %v385_v16   ;;  %v30_v35 = vld [vmem:[%s4233_s0 + $0x20] sm:$0xff]  ;;  %v942_v37 = vld [vmem:[%s4234_s4 + $0x88] sm:$0xff]  ;;  %v802_v40 = vld [vmem:[%s4234_s4 + $0x70] sm:$0xff] }
   0xe   :  { %2841 = vmatprep.subr.mxu0 %v51_v8  ;;  %396 = vperm.xlu1 %3255, %v386_v17   ;;  %v31_v38 = vld [vmem:[%s4233_s0 + $0x28] sm:$0xff]  ;;  %v943_v41 = vld [vmem:[%s4234_s4 + $0x90] sm:$0xff]  ;;  %v33_v42 = vld [vmem:[%s4233_s0 + $0x38] sm:$0xff] }
   0xf   :  { %2842 = vmatpush3.msra.mxu0 %v51_v8  ;;  %v34_v43 = vld [vmem:[%s4233_s0 + $0x40] sm:$0xff]  ;;  %v803_v44 = vld [vmem:[%s4234_s4 + $0x78] sm:$0xff]  ;;  %v35_v46 = vld [vmem:[%s4233_s0 + $0x48] sm:$0xff] }
  0x10   :  { %2843 = vmatprep.subr.mxu0 %v50_v11  ;;  %v944_v45 = vld [vmem:[%s4234_s4 + $0x98] sm:$0xff]  ;;  %v36_v47 = vld [vmem:[%s4233_s0 + $0x50] sm:$0xff]  ;;  %v1308_v48 = vld [vmem:[%s4234_s4 + $0xe0] sm:$0xff] }
  0x11   :  { %2844 = vmatpush3.msra.mxu0 %v50_v11  ;;  %401 = vperm.xlu0 %3254, %v387_v20   ;;  %v1449_v49 = vld [vmem:[%s4234_s4 + $0x100] sm:$0xff]  ;;  %v37_v50 = vld [vmem:[%s4233_s0 + $0x58] sm:$0xff]  ;;  %v1309_v52 = vld [vmem:[%s4234_s4 + $0xe8] sm:$0xff] }
  0x12   :  { %2845 = vmatprep.subr.mxu0 %v49_v14  ;;  %406 = vperm.xlu1 %3255, %v388_v21   ;;  %v38_v51 = vld [vmem:[%s4233_s0 + $0x60] sm:$0xff]  ;;  %v1450_v53 = vld [vmem:[%s4234_s4 + $0x108] sm:$0xff]  ;;  %v40_v55 = vld [vmem:[%s4233_s0 + $0x70] sm:$0xff] }
  0x13   :  { %2846 = vmatpush3.msra.mxu0 %v49_v14  ;;  %v39_v54 = vld [vmem:[%s4233_s0 + $0x68] sm:$0xff]  ;;  %v1310_v56 = vld [vmem:[%s4234_s4 + $0xf0] sm:$0xff]  ;;  %v41_v58 = vld [vmem:[%s4233_s0 + $0x78] sm:$0xff] }
  0x14   :  { %2847 = vmatprep.subr.mxu0 %v48_v15  ;;  %v1451_v57 = vld [vmem:[%s4234_s4 + $0x110] sm:$0xff]  ;;  %v1311_v59 = vld [vmem:[%s4234_s4 + $0xf8] sm:$0xff]  ;;  %v1816_v61 = vld [vmem:[%s4234_s4 + $0x160] sm:$0xff] }
  0x15   :  { %2848 = vmatpush3.msra.mxu0 %v48_v15  ;;  %665 = vperm.xlu0 %3254, %v659_v24   ;;  %v1452_v60 = vld [vmem:[%s4234_s4 + $0x118] sm:$0xff]  ;;  %v1957_v62 = vld [vmem:[%s4234_s4 + $0x180] sm:$0xff]  ;;  %v1817_v63 = vld [vmem:[%s4234_s4 + $0x168] sm:$0xff] }
  0x16   :  { %2849 = vmatprep.subr.mxu0 %v47_v18  ;;  %670 = vperm.xlu1 %3255, %v660_v25   ;;  %v1958_v0 = vld [vmem:[%s4234_s4 + $0x188] sm:$0xff]  ;;  %v1818_v1 = vld [vmem:[%s4234_s4 + $0x170] sm:$0xff]  ;;  %v1819_v3 = vld [vmem:[%s4234_s4 + $0x178] sm:$0xff] }
  0x17   :  { %2850 = vmatpush3.msra.mxu0 %v47_v18  ;;  %v1959_v2 = vld [vmem:[%s4234_s4 + $0x190] sm:$0xff]  ;;  %v1960_v4 = vld [vmem:[%s4234_s4 + $0x198] sm:$0xff]  ;;  %v2098_v5 = vld [vmem:[%s4234_s4 + $0x1a0] sm:$0xff] }
  0x18   :  { %2851 = vmatprep.subr.mxu0 %v46_v19  ;;  %v2239_v6 = vld [vmem:[%s4234_s4 + $0x1c0] sm:$0xff]  ;;  %v2099_v7 = vld [vmem:[%s4234_s4 + $0x1a8] sm:$0xff]  ;;  %v2100_v9 = vld [vmem:[%s4234_s4 + $0x1b0] sm:$0xff] }
  0x19   :  { %2852 = vmatpush3.msra.mxu0 %v46_v19  ;;  %675 = vperm.xlu0 %3254, %v661_v28   ;;  %v2240_v8 = vld [vmem:[%s4234_s4 + $0x1c8] sm:$0xff]  ;;  %v2241_v10 = vld [vmem:[%s4234_s4 + $0x1d0] sm:$0xff]  ;;  %v2101_v11 = vld [vmem:[%s4234_s4 + $0x1b8] sm:$0xff] }
  0x1a   :  { %2853 = vmatprep.subr.mxu0 %v45_v22  ;;  %680 = vperm.xlu1 %3255, %v662_v29   ;;  %v2242_v12 = vld [vmem:[%s4234_s4 + $0x1d8] sm:$0xff]  ;;  %v2380_v13 = vld [vmem:[%s4234_s4 + $0x1e0] sm:$0xff]  ;;  %v2382_v14 = vld [vmem:[%s4234_s4 + $0x1f0] sm:$0xff] }
  0x1b   :  { %2854 = vmatpush3.msra.mxu0 %v45_v22  ;;  %v2381_v15 = vld [vmem:[%s4234_s4 + $0x1e8] sm:$0xff]  ;;  %v2383_v16 = vld [vmem:[%s4234_s4 + $0x1f8] sm:$0xff]  ;;  %v459_v19 = vld [vmem:[%s4235_s5 + $0x70] sm:$0xff] }
  0x1c   :  { %2855 = vmatprep.subr.mxu0 %v44_v23  ;;  %v460_v17 = vld [vmem:[%s4235_s5 + $0x78] sm:$0xff]  ;;  %v834_v20 = vld [vmem:[%s4235_s5 + $0xf0] sm:$0xff]  ;;  %v458_v21 = vld [vmem:[%s4235_s5 + $0x68] sm:$0xff] }
  0x1d   :  { %2856 = vmatpush3.msra.mxu0 %v44_v23  ;;  %806 = vperm.xlu0 %3254, %v800_v32   ;;  %v835_v18 = vld [vmem:[%s4235_s5 + $0xf8] sm:$0xff]  ;;  %v833_v22 = vld [vmem:[%s4235_s5 + $0xe8] sm:$0xff]  ;;  %v457_v23 = vld [vmem:[%s4235_s5 + $0x60] sm:$0xff] }
  0x1e   :  { %2857 = vmatprep.subr.mxu0 %v43_v26  ;;  %947 = vperm.xlu1 %3255, %v941_v33   ;;  %v832_v24 = vld [vmem:[%s4235_s5 + $0xe0] sm:$0xff]  ;;  %v456_v25 = vld [vmem:[%s4235_s5 + $0x58] sm:$0xff]  ;;  %v830_v28 = vld [vmem:[%s4235_s5 + $0xd0] sm:$0xff] }
  0x1f   :  { %2858 = vmatpush3.msra.mxu0 %v43_v26  ;;  %2885 = vmatprep.subr.mxu1 %v460_v17  ;;  %v831_v26 = vld [vmem:[%s4235_s5 + $0xd8] sm:$0xff]  ;;  %v454_v29 = vld [vmem:[%s4235_s5 + $0x48] sm:$0xff]  ;;  %v828_v32 = vld [vmem:[%s4235_s5 + $0xc0] sm:$0xff] }
  0x20   :  { %2859 = vmatprep.subr.mxu0 %v42_v27  ;;  %2886 = vmatpush3.msra.mxu1 %v460_v17  ;;  %v3599_v33 = vld [vmem:[%s4235_s5 + $0x38] sm:$0xff] }
  0x21   :  { %2860 = vmatpush3.msra.mxu0 %v42_v27  ;;  %811 = vperm.xlu0 %3254, %v801_v36   ;;  %v455_v27 = vld [vmem:[%s4235_s5 + $0x50] sm:$0xff] }
  0x22   :  { %2862 = vmatmul.mubr.f32.vlgmr.msra.gmra.mxu0 %v27_v30  ;;  %952 = vperm.xlu1 %3255, %v942_v37   ;;  %v829_v30 = vld [vmem:[%s4235_s5 + $0xc8] sm:$0xff] }
  0x23   :  { %2864 = vmatprep.mubr.f32.mxu0 %v28_v31  ;;  %2951 = vmatprep.subr.mxu0 %v835_v18  ;;  %v453_v31 = vld [vmem:[%s4235_s5 + $0x40] sm:$0xff] }
  0x24   :  { %2952 = vmatpush3.msra.mxu0 %v835_v18  ;;  %2887 = vmatprep.subr.mxu1 %v459_v19 }
  0x25   :  { %816 = vperm.xlu0 %3254, %v802_v40   ;;  %2953 = vmatprep.subr.mxu0 %v834_v20 }
  0x26   :  { %2865 = vmatmul.mubr.f32.gmra.mxu0 %v29_v34  ;;  %957 = vperm.xlu1 %3255, %v943_v41   ;;  %v3605_v34 = vld [vmem:[%s4235_s5 + $0x178] sm:$0xff] }
  0x27   :  { %2867 = vmatprep.mubr.f32.mxu0 %v30_v35  ;;  %2888 = vmatpush3.msra.mxu1 %v459_v19 }
  0x28   :  { %2954 = vmatpush3.msra.mxu0 %v834_v20  ;;  %2889 = vmatprep.subr.mxu1 %v458_v21 }
  0x29   :  { %821 = vperm.xlu0 %3254, %v803_v44   ;;  %2955 = vmatprep.subr.mxu0 %v833_v22 }
  0x2a   :  { %2868 = vmatmul.mubr.f32.gmra.mxu0 %v31_v38  ;;  %962 = vperm.xlu1 %3255, %v944_v45  }
  0x2b   :  { %2870 = vmatprep.mubr.f32.mxu0 %v32_v39  ;;  %2890 = vmatpush3.msra.mxu1 %v458_v21 }
  0x2c   :  { %2956 = vmatpush3.msra.mxu0 %v833_v22  ;;  %2891 = vmatprep.subr.mxu1 %v457_v23 }
  0x2d   :  { %1314 = vperm.xlu0 %3254, %v1308_v48   ;;  %2957 = vmatprep.subr.mxu0 %v832_v24 }
  0x2e   :  { %2871 = vmatmul.mubr.f32.gmra.mxu0 %v33_v42  ;;  %1455 = vperm.xlu1 %3255, %v1449_v49  }
  0x2f   :  { %2873 = vmatprep.mubr.f32.mxu0 %v34_v43  ;;  %2892 = vmatpush3.msra.mxu1 %v457_v23 }
  0x30   :  { %2958 = vmatpush3.msra.mxu0 %v832_v24  ;;  %2893 = vmatprep.subr.mxu1 %v456_v25 }
  0x31   :  { %1319 = vperm.xlu0 %3254, %v1309_v52   ;;  %2959 = vmatprep.subr.mxu0 %v831_v26 }
  0x32   :  { %2874 = vmatmul.mubr.f32.gmra.mxu0 %v35_v46  ;;  %1460 = vperm.xlu1 %3255, %v1450_v53  }
  0x33   :  { %2876 = vmatprep.mubr.f32.mxu0 %v36_v47  ;;  %2894 = vmatpush3.msra.mxu1 %v456_v25 }
  0x34   :  { %2960 = vmatpush3.msra.mxu0 %v831_v26  ;;  %2895 = vmatprep.subr.mxu1 %v455_v27 }
  0x35   :  { %1324 = vperm.xlu0 %3254, %v1310_v56   ;;  %2961 = vmatprep.subr.mxu0 %v830_v28 }
  0x36   :  { %2877 = vmatmul.mubr.f32.gmra.mxu0 %v37_v50  ;;  %1465 = vperm.xlu1 %3255, %v1451_v57  }
  0x37   :  { %2879 = vmatprep.mubr.f32.mxu0 %v38_v51  ;;  %2896 = vmatpush3.msra.mxu1 %v455_v27 }
  0x38   :  { %2962 = vmatpush3.msra.mxu0 %v830_v28  ;;  %2897 = vmatprep.subr.mxu1 %v454_v29 }
  0x39   :  { %1329 = vperm.xlu0 %3254, %v1311_v59   ;;  %2963 = vmatprep.subr.mxu0 %v829_v30 }
  0x3a   :  { %2880 = vmatmul.mubr.f32.gmra.mxu0 %v39_v54  ;;  %1470 = vperm.xlu1 %3255, %v1452_v60  }
  0x3b   :  { %2882 = vmatprep.mubr.f32.mxu0 %v40_v55  ;;  %2898 = vmatpush3.msra.mxu1 %v454_v29 }
  0x3c   :  { %2964 = vmatpush3.msra.mxu0 %v829_v30  ;;  %2899 = vmatprep.subr.mxu1 %v453_v31 }
  0x3d   :  { %1822 = vperm.xlu0 %3254, %v1816_v61   ;;  %2965 = vmatprep.subr.mxu0 %v828_v32 }
  0x3e   :  { %2883 = vmatmul.mubr.f32.gmra.mxu0 %v41_v58  ;;  %1963 = vperm.xlu1 %3255, %v1957_v62  }
  0x3f   :  { %2900 = vmatpush3.msra.mxu1 %v453_v31  ;;  %2966 = vmatpush3.msra.mxu0 %v828_v32 }
  0x40   :  { %2907 = vmatprep.subr.mxu1 %v3599_v33  ;;  %2995 = vmatprep.subr.mxu0 %v3605_v34 }
  0x41   :  { %1827 = vperm.xlu0 %3254, %v1817_v63  }
  0x42   :  { %1968 = vperm.xlu1 %3255, %v1958_v0  }
  0x45   :  { %1832 = vperm.xlu0 %3254, %v1818_v1  }
  0x46   :  { %1973 = vperm.xlu1 %3255, %v1959_v2  }
  0x49   :  { %1837 = vperm.xlu0 %3254, %v1819_v3  }
  0x4a   :  { %1978 = vperm.xlu1 %3255, %v1960_v4  }
  0x4d   :  { %2104 = vperm.xlu0 %3254, %v2098_v5  }
  0x4e   :  { %2245 = vperm.xlu1 %3255, %v2239_v6  }
  0x51   :  { %2109 = vperm.xlu0 %3254, %v2099_v7  }
  0x52   :  { %2250 = vperm.xlu1 %3255, %v2240_v8  }
  0x55   :  { %2114 = vperm.xlu0 %3254, %v2100_v9  }
  0x56   :  { %2255 = vperm.xlu1 %3255, %v2241_v10  }
  0x59   :  { %2119 = vperm.xlu0 %3254, %v2101_v11  }
  0x5a   :  { %2260 = vperm.xlu1 %3255, %v2242_v12  }
  0x5d   :  { %2386 = vperm.xlu0 %3254, %v2380_v13  }
  0x5e   :  { %2396 = vperm.xlu1 %3255, %v2382_v14  }
  0x61   :  { %2391 = vperm.xlu0 %3254, %v2381_v15  }
  0x62   :  { %2401 = vperm.xlu1 %3255, %v2383_v16  }
  0xe2   :  { %v3608_v35 = vpop.f32.mrf.mxu0 }
  0xe3   :  { %v243_v37 = vmul.f32 %v3608_v35, %v3608_v35  ;;  %v205_v41 = vsel %vm203_vm0, %v3608_v35, 0.0 }
  0xe4   :  { %v3610_v36 = vpop.f32.mrf.mxu0 }
  0xe5   :  { %v204_v38 = vsel %vm203_vm0, %v3610_v36, 0.0  ;;  %v242_v39 = vmul.f32 %v3610_v36, %v3610_v36  ;;  %v259_v45 = vsel %vm203_vm0, %v243_v37, 0.0 }
  0xe6   :  { %v3618_v40 = vpop.f32.mrf.mxu0  ;;  %v206_v43 = vadd.f32 %v205_v41, %v204_v38 }
  0xe7   :  { %v258_v42 = vsel %vm203_vm0, %v242_v39, 0.0  ;;  %v245_v46 = vmul.f32 %v3618_v40, %v3618_v40  ;;  %v209_v52 = vsel %vm203_vm0, %v3618_v40, 0.0 }
  0xe8   :  { %v3623_v44 = vpop.f32.mrf.mxu0  ;;  %v260_v49 = vadd.f32 %v259_v45, %v258_v42 }
  0xe9   :  { %v207_v47 = vsel %vm203_vm0, %v3623_v44, 0.0  ;;  %v244_v48 = vmul.f32 %v3623_v44, %v3623_v44  ;;  %v263_v57 = vsel %vm203_vm0, %v245_v46, 0.0 }
  0xea   :  { %v208_v50 = vadd.f32 %v207_v47, %v206_v43  ;;  %v3632_v51 = vpop.f32.mrf.mxu0 }
  0xeb   :  { %v261_v53 = vsel %vm203_vm0, %v244_v48, 0.0  ;;  %v247_v58 = vmul.f32 %v3632_v51, %v3632_v51  ;;  %v213_v0 = vsel %vm203_vm0, %v3632_v51, 0.0 }
  0xec   :  { %v262_v54 = vadd.f32 %v261_v53, %v260_v49  ;;  %v3637_v55 = vpop.f32.mrf.mxu0  ;;  %v210_v56 = vadd.f32 %v209_v52, %v208_v50 }
  0xed   :  { %v211_v59 = vsel %vm203_vm0, %v3637_v55, 0.0  ;;  %v246_v60 = vmul.f32 %v3637_v55, %v3637_v55  ;;  %v267_v5 = vsel %vm203_vm0, %v247_v58, 0.0 }
  0xee   :  { %v212_v61 = vadd.f32 %v211_v59, %v210_v56  ;;  %v264_v62 = vadd.f32 %v263_v57, %v262_v54  ;;  %v3646_v63 = vpop.f32.mrf.mxu0 }
  0xef   :  { %v265_v1 = vsel %vm203_vm0, %v246_v60, 0.0  ;;  %v249_v6 = vmul.f32 %v3646_v63, %v3646_v63  ;;  %v217_v12 = vsel %vm203_vm0, %v3646_v63, 0.0 }
  0xf0   :  { %v266_v2 = vadd.f32 %v265_v1, %v264_v62  ;;  %v3651_v3 = vpop.f32.mrf.mxu0  ;;  %v214_v4 = vadd.f32 %v213_v0, %v212_v61 }
  0xf1   :  { %v215_v7 = vsel %vm203_vm0, %v3651_v3, 0.0  ;;  %v248_v8 = vmul.f32 %v3651_v3, %v3651_v3  ;;  %v271_v17 = vsel %vm203_vm0, %v249_v6, 0.0 }
  0xf2   :  { %v216_v9 = vadd.f32 %v215_v7, %v214_v4  ;;  %v268_v10 = vadd.f32 %v267_v5, %v266_v2  ;;  %v3660_v11 = vpop.f32.mrf.mxu0 }
  0xf3   :  { %v269_v13 = vsel %vm203_vm0, %v248_v8, 0.0  ;;  %v251_v18 = vmul.f32 %v3660_v11, %v3660_v11  ;;  %v221_v24 = vsel %vm203_vm0, %v3660_v11, 0.0 }
  0xf4   :  { %v270_v14 = vadd.f32 %v269_v13, %v268_v10  ;;  %v3665_v15 = vpop.f32.mrf.mxu0  ;;  %v218_v16 = vadd.f32 %v217_v12, %v216_v9 }
  0xf5   :  { %v219_v19 = vsel %vm203_vm0, %v3665_v15, 0.0  ;;  %v250_v20 = vmul.f32 %v3665_v15, %v3665_v15  ;;  %v275_v29 = vsel %vm203_vm0, %v251_v18, 0.0 }
  0xf6   :  { %v220_v21 = vadd.f32 %v219_v19, %v218_v16  ;;  %v272_v22 = vadd.f32 %v271_v17, %v270_v14  ;;  %v3674_v23 = vpop.f32.mrf.mxu0 }
  0xf7   :  { %v273_v25 = vsel %vm203_vm0, %v250_v20, 0.0  ;;  %v253_v30 = vmul.f32 %v3674_v23, %v3674_v23  ;;  %v225_v41 = vsel %vm203_vm0, %v3674_v23, 0.0 }
  0xf8   :  { %v274_v26 = vadd.f32 %v273_v25, %v272_v22  ;;  %v3679_v27 = vpop.f32.mrf.mxu0  ;;  %v222_v28 = vadd.f32 %v221_v24, %v220_v21 }
  0xf9   :  { %v223_v31 = vsel %vm203_vm0, %v3679_v27, 0.0  ;;  %v252_v32 = vmul.f32 %v3679_v27, %v3679_v27  ;;  %v279_v47 = vsel %vm203_vm0, %v253_v30, 0.0  ;;  %v3715_v30 = vpop.permute.xlu0 %431 }
  0xfa   :  { %v224_v37 = vadd.f32 %v223_v31, %v222_v28  ;;  %v276_v38 = vadd.f32 %v275_v29, %v274_v26  ;;  %v3688_v39 = vpop.f32.mrf.mxu0 }
  0xfb   :  { %v277_v42 = vsel %vm203_vm0, %v252_v32, 0.0  ;;  %v255_v48 = vmul.f32 %v3688_v39, %v3688_v39  ;;  %v229_v56 = vsel %vm203_vm0, %v3688_v39, 0.0 }
  0xfc   :  { %v278_v43 = vadd.f32 %v277_v42, %v276_v38  ;;  %v3693_v45 = vpop.f32.mrf.mxu0  ;;  %v226_v46 = vadd.f32 %v225_v41, %v224_v37  ;;  %v306_v38 = vlaneseq }
  0xfd   :  { %v227_v49 = vsel %vm203_vm0, %v3693_v45, 0.0  ;;  %v254_v50 = vmul.f32 %v3693_v45, %v3693_v45  ;;  %v283_v61 = vsel %vm203_vm0, %v255_v48, 0.0  ;;  %v3717_v37 = vpop.permute.xlu0 %436 }
  0xfe   :  { %v228_v52 = vadd.f32 %v227_v49, %v226_v46  ;;  %v280_v53 = vadd.f32 %v279_v47, %v278_v43  ;;  %v3702_v54 = vpop.f32.mrf.mxu0  ;;  %v307_v42 = vshrl.u32 %v306_v38, 7  ;;  %v298_v43 = vld [vmem:[%s4236_s2] sm:$0x1] }
  0xff   :  { %v281_v57 = vsel %vm203_vm0, %v254_v50, 0.0  ;;  %v257_v62 = vmul.f32 %v3702_v54, %v3702_v54  ;;  %v233_v5 = vsel %vm203_vm0, %v3702_v54, 0.0  ;;  %v302_v50 = vld [vmem:[%s4237_s3] sm:$0x1] }
 0x100   :  { %v282_v58 = vadd.f32 %v281_v57, %v280_v53  ;;  %v194_v59 = vpop.f32.mrf.mxu0  ;;  %v230_v60 = vadd.f32 %v229_v56, %v228_v52  ;;  %v308_v46 = vsub.s32 0, %v307_v42 }
 0x101   :  { %v231_v0 = vsel %vm203_vm0, %v194_v59, 0.0  ;;  %v256_v1 = vmul.f32 %v194_v59, %v194_v59  ;;  %v287_v9 = vsel %vm203_vm0, %v257_v62, 0.0  ;;  %v3719_v41 = vpop.permute.xlu0 %391 }
 0x102   :  { %v232_v2 = vadd.f32 %v231_v0, %v230_v60  ;;  %v284_v4 = vadd.f32 %v283_v61, %v282_v58 }
 0x103   :  { %v285_v6 = vsel %vm203_vm0, %v256_v1, 0.0 }
 0x104   :  { %v234_v7 = vadd.f32 %v233_v5, %v232_v2  ;;  %v286_v8 = vadd.f32 %v285_v6, %v284_v4 }
 0x105   :  { %v3724_v48 = vpop.permute.xlu0 %401 }
 0x106   :  { %v235_v10 = vrot.slane %v234_v7, 4  ;;  %v288_v12 = vadd.f32 %v287_v9, %v286_v8 }
 0x108   :  { %v236_v13 = vadd.f32 %v235_v10, %v234_v7  ;;  %v289_v14 = vrot.slane %v288_v12, 4 }
 0x109   :  { %v3735_v2 = vpop.permute.xlu0 %665 }
 0x10a   :  { %v237_v16 = vrot.slane %v236_v13, 2  ;;  %v290_v17 = vadd.f32 %v289_v14, %v288_v12 }
 0x10c   :  { %v238_v18 = vadd.f32 %v237_v16, %v236_v13  ;;  %v291_v19 = vrot.slane %v290_v17, 2 }
 0x10e   :  { %v239_v20 = vrot.slane %v238_v18, 1  ;;  %v292_v21 = vadd.f32 %v291_v19, %v290_v17 }
 0x110   :  { %v240_v22 = vadd.f32 %v239_v20, %v238_v18  ;;  %v293_v24 = vrot.slane %v292_v21, 1  ;;  %v3744_v18 = vpop.permute.xlu0 %675 }
 0x112   :  { %v241_v25 = vmul.f32 0.0078125, %v240_v22  ;;  %v294_v26 = vadd.f32 %v293_v24, %v292_v21 }
 0x114   :  { %v295_v28 = vmul.f32 0.0078125, %v294_v26  ;;  %v296_v29 = vmul.f32 %v241_v25, %v241_v25 }
 0x116   :  { %v297_v31 = vsub.f32 %v295_v28, %v296_v29 }
 0x118   :  { %v299_v32 = vadd.f32 1e-05, %v297_v31 }
 0x11a   :  { %3256 = vrsqrt.f32 %v299_v32 }
 0x127   :  { %v3257_v47 = vpop.eup %3256 }
 0x128   :  { %v301_v49 = vmul.f32 %v3257_v47, %v298_v43 }
 0x12a   :  { %v303_v52 = vmul.f32 %v301_v49, %v241_v25  ;;  %v309_v53 = vrot.slane %v301_v49, %v308_v46 }
 0x12c   :  { %v304_v56 = vsub.f32 %v302_v50, %v303_v52  ;;  %v325_v57 = vmul.f32 %v309_v53, %v194_v59  ;;  %v317_v58 = vmul.f32 %v309_v53, %v3651_v3  ;;  %v318_v60 = vmul.f32 %v3646_v63, %v309_v53  ;;  %v442_v50 = vpop.permute.xlu1 %441 }
 0x12d   :  { %v311_v61 = vmul.f32 %v309_v53, %v3610_v36  ;;  %v312_v62 = vmul.f32 %v3608_v35, %v309_v53  ;;  %v322_v0 = vmul.f32 %v3674_v23, %v309_v53  ;;  %v323_v1 = vmul.f32 %v309_v53, %v3693_v45 }
 0x12e   :  { %v331_v4 = vrot.slane %v304_v56, %v308_v46  ;;  %v313_v5 = vmul.f32 %v309_v53, %v3623_v44  ;;  %v324_v6 = vmul.f32 %v3688_v39, %v309_v53  ;;  %v314_v59 = vmul.f32 %v3618_v40, %v309_v53  ;;  %v807_v46 = vpop.permute.xlu0 %806 }
 0x12f   :  { %v315_v3 = vmul.f32 %v309_v53, %v3637_v55  ;;  %v326_v63 = vmul.f32 %v3702_v54, %v309_v53  ;;  %v319_v36 = vmul.f32 %v309_v53, %v3665_v15  ;;  %v320_v35 = vmul.f32 %v3660_v11, %v309_v53 }
 0x130   :  { %v347_v23 = vadd.f32 %v331_v4, %v325_v57  ;;  %v339_v7 = vadd.f32 %v331_v4, %v317_v58  ;;  %v340_v45 = vadd.f32 %v331_v4, %v318_v60  ;;  %v333_v8 = vadd.f32 %v331_v4, %v311_v61 }
 0x131   :  { %v334_v9 = vadd.f32 %v331_v4, %v312_v62  ;;  %v344_v10 = vadd.f32 %v331_v4, %v322_v0  ;;  %v345_v12 = vadd.f32 %v331_v4, %v323_v1  ;;  %v335_v44 = vadd.f32 %v331_v4, %v313_v5 }
 0x132   :  { %v363_v13 = vmax.f32 %v347_v23, 0.0  ;;  %v355_v39 = vmax.f32 %v339_v7, 0.0  ;;  %v356_v14 = vmax.f32 %v340_v45, 0.0  ;;  %v349_v40 = vmax.f32 %v333_v8, 0.0  ;;  %v812_v47 = vpop.permute.xlu0 %811  ;;  %v417_v7 = vld [vmem:[%s4235_s5 + $0x20] sm:$0xff] }
 0x133   :  { %v350_v16 = vmax.f32 %v334_v9, 0.0  ;;  %v360_v55 = vmax.f32 %v344_v10, 0.0  ;;  %v361_v17 = vmax.f32 %v345_v12, 0.0  ;;  %v351_v54 = vmax.f32 %v335_v44, 0.0  ;;  %v1086_v45 = vld [vmem:[%s4235_s5 + $0x160] sm:$0xff]  ;;  %v416_v9 = vld [vmem:[%s4235_s5 + $0x18] sm:$0xff] }
 0x134   :  { %379 = vst.msk [vmem:[#allocation2 + $0x70] sm:$0xff] %vm203_vm0, %v363_v13  ;;  %371 = vst.msk [vmem:[#allocation2 + $0x30] sm:$0xff] %vm203_vm0, %v355_v39  ;;  %v346_v11 = vadd.f32 %v331_v4, %v324_v6  ;;  %v336_v15 = vadd.f32 %v331_v4, %v314_v59  ;;  %v337_v19 = vadd.f32 %v331_v4, %v315_v3  ;;  %v418_v59 = vld [vmem:[%s4235_s5 + $0x28] sm:$0xff]  ;;  %v1085_v12 = vld [vmem:[%s4235_s5 + $0x158] sm:$0xff] }
 0x135   :  { %372 = vst.msk [vmem:[#allocation2 + $0x38] sm:$0xff] %vm203_vm0, %v356_v14  ;;  %365 = vst.msk [vmem:[#allocation2] sm:$0xff] %vm203_vm0, %v349_v40  ;;  %v348_v20 = vadd.f32 %v331_v4, %v326_v63  ;;  %v341_v21 = vadd.f32 %v331_v4, %v319_v36  ;;  %v342_v22 = vadd.f32 %v331_v4, %v320_v35  ;;  %v447_v63 = vpop.permute.xlu1 %446  ;;  %v1084_v44 = vld [vmem:[%s4235_s5 + $0x150] sm:$0xff]  ;;  %v414_v13 = vld [vmem:[%s4235_s5 + $0x8] sm:$0xff] }
 0x136   :  { %366 = vst.msk [vmem:[#allocation2 + $0x8] sm:$0xff] %vm203_vm0, %v350_v16  ;;  %376 = vst.msk [vmem:[#allocation2 + $0x58] sm:$0xff] %vm203_vm0, %v360_v55  ;;  %v316_v24 = vmul.f32 %v3632_v51, %v309_v53  ;;  %v321_v25 = vmul.f32 %v309_v53, %v3679_v27  ;;  %v362_v26 = vmax.f32 %v346_v11, 0.0  ;;  %v352_v28 = vmax.f32 %v336_v15, 0.0  ;;  %v817_v58 = vpop.permute.xlu0 %816  ;;  %v1083_v39 = vld [vmem:[%s4235_s5 + $0x148] sm:$0xff]  ;;  %v413_v14 = vld [vmem:[%s4235_s5] sm:$0xff] }
 0x137   :  { %377 = vst.msk [vmem:[#allocation2 + $0x60] sm:$0xff] %vm203_vm0, %v361_v17  ;;  %367 = vst.msk [vmem:[#allocation2 + $0x10] sm:$0xff] %vm203_vm0, %v351_v54  ;;  %v353_v29 = vmax.f32 %v337_v19, 0.0  ;;  %v364_v31 = vmax.f32 %v348_v20, 0.0  ;;  %v357_v32 = vmax.f32 %v341_v21, 0.0  ;;  %v358_v38 = vmax.f32 %v342_v22, 0.0 }
 0x138   :  { %v338_v42 = vadd.f32 %v331_v4, %v316_v24  ;;  %v343_v43 = vadd.f32 %v331_v4, %v321_v25  ;;  %378 = vst.msk [vmem:[#allocation2 + $0x68] sm:$0xff] %vm203_vm0, %v362_v26  ;;  %368 = vst.msk [vmem:[#allocation2 + $0x18] sm:$0xff] %vm203_vm0, %v352_v28  ;;  %v1082_v16 = vld [vmem:[%s4235_s5 + $0x140] sm:$0xff]  ;;  %v694_v11 = vld [vmem:[%s4235_s5 + $0xb8] sm:$0xff] }
 0x139   :  { %369 = vst.msk [vmem:[#allocation2 + $0x20] sm:$0xff] %vm203_vm0, %v353_v29  ;;  %380 = vst.msk [vmem:[#allocation2 + $0x78] sm:$0xff] %vm203_vm0, %v364_v31  ;;  %v397_v55 = vpop.permute.xlu1 %396  ;;  %v1343_v15 = vld [vmem:[%s4235_s5 + $0x1f8] sm:$0xff]  ;;  %v693_v21 = vld [vmem:[%s4235_s5 + $0xb0] sm:$0xff] }
 0x13a   :  { %373 = vst.msk [vmem:[#allocation2 + $0x40] sm:$0xff] %vm203_vm0, %v357_v32  ;;  %374 = vst.msk [vmem:[#allocation2 + $0x48] sm:$0xff] %vm203_vm0, %v358_v38  ;;  %v354_v51 = vmax.f32 %v338_v42, 0.0  ;;  %v359_v27 = vmax.f32 %v343_v43, 0.0  ;;  %v822_v36 = vpop.permute.xlu0 %821  ;;  %v1342_v25 = vld [vmem:[%s4235_s5 + $0x1f0] sm:$0xff]  ;;  %v692_v28 = vld [vmem:[%s4235_s5 + $0xa8] sm:$0xff] }
 0x13b   :  { %v1341_v32 = vld [vmem:[%s4235_s5 + $0x1e8] sm:$0xff] }
 0x13c   :  { %370 = vst.msk [vmem:[#allocation2 + $0x28] sm:$0xff] %vm203_vm0, %v354_v51  ;;  %375 = vst.msk [vmem:[#allocation2 + $0x50] sm:$0xff] %vm203_vm0, %v359_v27  ;;  %v1078_v10 = vld [vmem:[#allocation2] sm:$0xff] }
 0x13d   :  { %v1079_v19 = vld [vmem:[#allocation2 + $0x8] sm:$0xff]  ;;  %v407_v26 = vpop.permute.xlu1 %406  ;;  %v691_v51 = vld [vmem:[%s4235_s5 + $0xa0] sm:$0xff] }
 0x13e   :  { %v1080_v24 = vld [vmem:[#allocation2 + $0x10] sm:$0xff]  ;;  %v655_v29 = vld [vmem:[#allocation2 + $0x5c] sm:$0xff]  ;;  %v1315_v38 = vpop.permute.xlu0 %1314 }
 0x13f   :  { %v382_v40 = vld [vmem:[#allocation2 + $0x63] sm:$0xff]  ;;  %v383_v17 = vld [vmem:[#allocation2 + $0x6b] sm:$0xff]  ;;  %v1081_v42 = vld [vmem:[#allocation2 + $0x18] sm:$0xff]  ;;  %v683_v43 = vmul.f32 %v3735_v2, %v655_v29 }
 0x140   :  { %v410_v54 = vmul.f32 %v397_v55, %v382_v40  ;;  %v411_v20 = vmul.f32 %v3724_v48, %v383_v17  ;;  %v384_v22 = vld [vmem:[#allocation2 + $0x73] sm:$0xff]  ;;  %v1304_v31 = vld [vmem:[#allocation2 + $0x1] sm:$0xff] }
 0x141   :  { %v2238_v49 = vld [vmem:[#allocation2 + $0x3c] sm:$0xff]  ;;  %v422_v56 = vld [vmem:[#allocation2 + $0x44] sm:$0xff]  ;;  %v412_v48 = vmul.f32 %v407_v26, %v384_v22  ;;  %v1332_v27 = vmul.f32 %v1315_v38, %v1304_v31  ;;  %v1592_v55 = vld [vmem:[%s4235_s5 + $0x250] sm:$0xff] }
 0x142   :  { %v449_v52 = vmul.f32 %v2238_v49, %v3715_v30  ;;  %v796_v53 = vld [vmem:[#allocation2 + $0x3d] sm:$0xff]  ;;  %v797_v57 = vld [vmem:[#allocation2 + $0x45] sm:$0xff]  ;;  %v450_v61 = vmul.f32 %v3717_v37, %v422_v56  ;;  %v419_v30 = vld [vmem:[%s4235_s5 + $0x30] sm:$0xff] }
 0x143   :  { %v824_v60 = vmul.f32 %v807_v46, %v796_v53  ;;  %v825_v62 = vmul.f32 %v812_v47, %v797_v57  ;;  %v423_v0 = vld [vmem:[#allocation2 + $0x4c] sm:$0xff]  ;;  %v424_v6 = vld [vmem:[#allocation2 + $0x54] sm:$0xff]  ;;  %v1340_v46 = vld [vmem:[%s4235_s5 + $0x1e0] sm:$0xff]  ;;  %v671_v53 = vpop.permute.xlu1 %670 }
 0x144   :  { %v798_v1 = vld [vmem:[#allocation2 + $0x4d] sm:$0xff]  ;;  %2901 = vmatprep.mubr.msk.f32.mxu1 %vm203_vm0, %v449_v52  ;;  %v451_v4 = vmul.f32 %v442_v50, %v423_v0  ;;  %v799_v3 = vld [vmem:[#allocation2 + $0x55] sm:$0xff]  ;;  %v452_v35 = vmul.f32 %v447_v63, %v424_v6  ;;  %v1320_v50 = vpop.permute.xlu0 %1319 }
 0x145   :  { %2967 = vmatprep.mubr.msk.f32.mxu0 %vm203_vm0, %v824_v60  ;;  %2902 = vmatmul.mubr.msk.f32.vlgmr.msra.gmra.mxu1 %vm203_vm0, %v450_v61  ;;  %v826_v5 = vmul.f32 %v817_v58, %v798_v1  ;;  %v1088_v37 = vld [vmem:[%s4235_s5 + $0x170] sm:$0xff]  ;;  %v827_v23 = vmul.f32 %v822_v36, %v799_v3  ;;  %v690_v47 = vld [vmem:[%s4235_s5 + $0x98] sm:$0xff]  ;;  %v688_v56 = vld [vmem:[%s4235_s5 + $0x88] sm:$0xff] }
 0x146   :  { %2908 = vmatpush3.msra.mxu1 %v3599_v33  ;;  %2968 = vmatmul.mubr.msk.f32.vlgmr.msra.gmra.mxu0 %vm203_vm0, %v825_v62  ;;  %v1087_v33 = vld [vmem:[%s4235_s5 + $0x168] sm:$0xff]  ;;  %v1339_v2 = vld [vmem:[%s4235_s5 + $0x1d8] sm:$0xff]  ;;  %v689_v49 = vld [vmem:[%s4235_s5 + $0x90] sm:$0xff] }
 0x147   :  { %2996 = vmatpush3.msra.mxu0 %v3605_v34  ;;  %2904 = vmatprep.mubr.msk.f32.mxu1 %vm203_vm0, %v451_v4  ;;  %v381_v34 = vld [vmem:[#allocation2 + $0x5b] sm:$0xff]  ;;  %v1338_v52 = vld [vmem:[%s4235_s5 + $0x1d0] sm:$0xff]  ;;  %v1337_v57 = vld [vmem:[%s4235_s5 + $0x1c8] sm:$0xff] }
 0x148   :  { %2909 = vmatprep.subr.mxu1 %v419_v30  ;;  %2970 = vmatprep.mubr.msk.f32.mxu0 %vm203_vm0, %v826_v5  ;;  %v409_v8 = vmul.f32 %v3719_v41, %v381_v34  ;;  %v415_v41 = vld [vmem:[%s4235_s5 + $0x10] sm:$0xff]  ;;  %v687_v58 = vld [vmem:[%s4235_s5 + $0x80] sm:$0xff]  ;;  %v1325_v1 = vpop.permute.xlu0 %1324  ;;  %v976_v5 = vld [vmem:[%s4235_s5 + $0x138] sm:$0xff] }
 0x149   :  { %2997 = vmatprep.subr.mxu0 %v1088_v37  ;;  %2910 = vmatpush3.msra.mxu1 %v419_v30  ;;  %v656_v60 = vld [vmem:[#allocation2 + $0x64] sm:$0xff]  ;;  %v657_v0 = vld [vmem:[#allocation2 + $0x6c] sm:$0xff]  ;;  %v658_v36 = vld [vmem:[#allocation2 + $0x74] sm:$0xff] }
 0x14a   :  { %2998 = vmatpush3.msra.mxu0 %v1088_v37  ;;  %2911 = vmatprep.subr.mxu1 %v418_v59  ;;  %v1305_v61 = vld [vmem:[#allocation2 + $0x9] sm:$0xff]  ;;  %v1336_v62 = vld [vmem:[%s4235_s5 + $0x1c0] sm:$0xff]  ;;  %v1306_v4 = vld [vmem:[#allocation2 + $0x11] sm:$0xff]  ;;  %v684_v30 = vmul.f32 %v671_v53, %v656_v60  ;;  %v681_v37 = vpop.permute.xlu1 %680  ;;  %v685_v3 = vmul.f32 %v3744_v18, %v657_v0 }
 0x14b   :  { %2999 = vmatprep.subr.mxu0 %v1087_v33  ;;  %2905 = vmatmul.mubr.msk.f32.gmra.mxu1 %vm203_vm0, %v452_v35  ;;  %v1333_v6 = vmul.f32 %v1320_v50, %v1305_v61  ;;  %v1334_v63 = vmul.f32 %v1325_v1, %v1306_v4  ;;  %v1307_v35 = vld [vmem:[#allocation2 + $0x19] sm:$0xff]  ;;  %v1596_v34 = vld [vmem:[%s4235_s5 + $0x270] sm:$0xff]  ;;  %v970_v17 = vld [vmem:[%s4235_s5 + $0x108] sm:$0xff] }
 0x14c   :  { %2912 = vmatpush3.msra.mxu1 %v418_v59  ;;  %2971 = vmatmul.mubr.msk.f32.gmra.mxu0 %vm203_vm0, %v827_v23  ;;  %v1597_v59 = vld [vmem:[%s4235_s5 + $0x278] sm:$0xff]  ;;  %v1330_v18 = vpop.permute.xlu0 %1329  ;;  %v686_v23 = vmul.f32 %v681_v37, %v658_v36  ;;  %v1201_v31 = vld [vmem:[%s4235_s5 + $0x1b0] sm:$0xff]  ;;  %v1848_v53 = vld [vmem:[%s4235_s5 + $0x2e0] sm:$0xff] }
 0x14d   :  { %3000 = vmatpush3.msra.mxu0 %v1087_v33  ;;  %2913 = vmatprep.subr.mxu1 %v417_v7  ;;  %v975_v33 = vld [vmem:[%s4235_s5 + $0x130] sm:$0xff]  ;;  %v1851_v26 = vld [vmem:[%s4235_s5 + $0x2f8] sm:$0xff]  ;;  %v1845_v0 = vld [vmem:[%s4235_s5 + $0x2c8] sm:$0xff] }
 0x14e   :  { %2923 = vmatprep.mubr.msk.f32.mxu1 %vm203_vm0, %v409_v8  ;;  %3001 = vmatprep.subr.mxu0 %v1086_v45  ;;  %v948_v8 = vpop.permute.xlu1 %947  ;;  %v940_v29 = vld [vmem:[#allocation2 + $0x37] sm:$0xff]  ;;  %v1195_v1 = vld [vmem:[%s4235_s5 + $0x180] sm:$0xff]  ;;  %v1813_v4 = vld [vmem:[#allocation2 + $0x49] sm:$0xff] }
 0x14f   :  { %3011 = vmatprep.mubr.msk.f32.mxu0 %vm203_vm0, %v1078_v10  ;;  %2914 = vmatpush3.msra.mxu1 %v417_v7  ;;  %v974_v7 = vld [vmem:[%s4235_s5 + $0x128] sm:$0xff]  ;;  %v1850_v38 = vld [vmem:[%s4235_s5 + $0x2f0] sm:$0xff] }
 0x150   :  { %3002 = vmatpush3.msra.mxu0 %v1086_v45  ;;  %2915 = vmatprep.subr.mxu1 %v416_v9  ;;  %v937_v45 = vld [vmem:[#allocation2 + $0x1f] sm:$0xff]  ;;  %v1595_v10 = vld [vmem:[%s4235_s5 + $0x268] sm:$0xff]  ;;  %v1197_v60 = vld [vmem:[%s4235_s5 + $0x190] sm:$0xff] }
 0x151   :  { %3003 = vmatprep.subr.mxu0 %v1085_v12  ;;  %2916 = vmatpush3.msra.mxu1 %v416_v9  ;;  %v1335_v9 = vmul.f32 %v1330_v18, %v1307_v35  ;;  %v1846_v61 = vld [vmem:[%s4235_s5 + $0x2d0] sm:$0xff] }
 0x152   :  { %3004 = vmatpush3.msra.mxu0 %v1085_v12  ;;  %2917 = vmatprep.subr.mxu1 %v415_v41  ;;  %v965_v12 = vmul.f32 %v948_v8, %v937_v45  ;;  %v953_v40 = vpop.permute.xlu1 %952  ;;  %v1814_v37 = vld [vmem:[#allocation2 + $0x51] sm:$0xff]  ;;  %v1445_v45 = vld [vmem:[#allocation2 + $0x5f] sm:$0xff]  ;;  %v1482_v8 = vld [vmem:[%s4235_s5 + $0x228] sm:$0xff] }
 0x153   :  { %3005 = vmatprep.subr.mxu0 %v1084_v44  ;;  %2918 = vmatpush3.msra.mxu1 %v415_v41  ;;  %v973_v41 = vld [vmem:[%s4235_s5 + $0x120] sm:$0xff]  ;;  %v1193_v36 = vld [vmem:[#allocation2 + $0x30] sm:$0xff] }
 0x154   :  { %3006 = vmatpush3.msra.mxu0 %v1084_v44  ;;  %2919 = vmatprep.subr.mxu1 %v414_v13  ;;  %v1594_v44 = vld [vmem:[%s4235_s5 + $0x260] sm:$0xff]  ;;  %v1483_v35 = vld [vmem:[%s4235_s5 + $0x230] sm:$0xff] }
 0x155   :  { %3007 = vmatprep.subr.mxu0 %v1083_v39  ;;  %2920 = vmatpush3.msra.mxu1 %v414_v13  ;;  %v1586_v13 = vld [vmem:[#allocation2 + $0x40] sm:$0xff]  ;;  %v2132_v18 = vld [vmem:[%s4235_s5 + $0x370] sm:$0xff] }
 0x156   :  { %3008 = vmatpush3.msra.mxu0 %v1083_v39  ;;  %2921 = vmatprep.subr.mxu1 %v413_v14  ;;  %v972_v39 = vld [vmem:[%s4235_s5 + $0x118] sm:$0xff] }
 0x157   :  { %3009 = vmatprep.subr.mxu0 %v1082_v16  ;;  %2922 = vmatpush3.msra.mxu1 %v413_v14  ;;  %v1593_v14 = vld [vmem:[%s4235_s5 + $0x258] sm:$0xff] }
 0x158   :  { %3010 = vmatpush3.msra.mxu0 %v1082_v16  ;;  %2924 = vmatmul.mubr.msk.f32.vlgmr.msra.gmra.mxu1 %vm203_vm0, %v410_v54  ;;  %v971_v16 = vld [vmem:[%s4235_s5 + $0x110] sm:$0xff]  ;;  %v1591_v54 = vld [vmem:[%s4235_s5 + $0x248] sm:$0xff] }
 0x159   :  { %2929 = vmatprep.subr.mxu1 %v694_v11  ;;  %3012 = vmatmul.mubr.msk.f32.vlgmr.msra.gmra.mxu0 %vm203_vm0, %v1079_v19  ;;  %v1590_v19 = vld [vmem:[%s4235_s5 + $0x240] sm:$0xff] }
 0x15a   :  { %3039 = vmatprep.subr.mxu0 %v1343_v15  ;;  %2926 = vmatprep.mubr.msk.f32.mxu1 %vm203_vm0, %v411_v20  ;;  %v958_v20 = vpop.permute.xlu1 %957 }
 0x15b   :  { %2930 = vmatpush3.msra.mxu1 %v694_v11  ;;  %3014 = vmatprep.mubr.msk.f32.mxu0 %vm203_vm0, %v1080_v24  ;;  %v969_v11 = vld [vmem:[%s4235_s5 + $0x100] sm:$0xff]  ;;  %v1202_v24 = vld [vmem:[%s4235_s5 + $0x1b8] sm:$0xff] }
 0x15c   :  { %3040 = vmatpush3.msra.mxu0 %v1343_v15  ;;  %2931 = vmatprep.subr.mxu1 %v693_v21  ;;  %v938_v15 = vld [vmem:[#allocation2 + $0x27] sm:$0xff] }
 0x15d   :  { %3041 = vmatprep.subr.mxu0 %v1342_v25  ;;  %2932 = vmatpush3.msra.mxu1 %v693_v21  ;;  %v939_v21 = vld [vmem:[#allocation2 + $0x2f] sm:$0xff]  ;;  %v966_v22 = vmul.f32 %v953_v40, %v938_v15 }
 0x15e   :  { %3042 = vmatpush3.msra.mxu0 %v1342_v25  ;;  %2927 = vmatmul.mubr.msk.f32.gmra.mxu1 %vm203_vm0, %v412_v48  ;;  %v1823_v25 = vpop.permute.xlu0 %1822  ;;  %v1587_v48 = vld [vmem:[#allocation2 + $0x48] sm:$0xff] }
 0x15f   :  { %2933 = vmatprep.subr.mxu1 %v692_v28  ;;  %3015 = vmatmul.mubr.msk.f32.gmra.mxu0 %vm203_vm0, %v1081_v42  ;;  %v963_v42 = vpop.permute.xlu1 %962  ;;  %v1478_v15 = vld [vmem:[%s4235_s5 + $0x208] sm:$0xff] }
 0x160   :  { %3043 = vmatprep.subr.mxu0 %v1341_v32  ;;  %2934 = vmatpush3.msra.mxu1 %v692_v28  ;;  %v967_v28 = vmul.f32 %v958_v20, %v939_v21  ;;  %v1446_v20 = vld [vmem:[#allocation2 + $0x67] sm:$0xff] }
 0x161   :  { %2945 = vmatprep.mubr.msk.f32.mxu1 %vm203_vm0, %v683_v43  ;;  %3044 = vmatpush3.msra.mxu0 %v1341_v32  ;;  %v1588_v32 = vld [vmem:[#allocation2 + $0x50] sm:$0xff]  ;;  %v968_v43 = vmul.f32 %v963_v42, %v940_v29 }
 0x162   :  { %3055 = vmatprep.mubr.msk.f32.mxu0 %vm203_vm0, %v1332_v27  ;;  %2935 = vmatprep.subr.mxu1 %v691_v51  ;;  %v1812_v27 = vld [vmem:[#allocation2 + $0x41] sm:$0xff]  ;;  %v2096_v29 = vld [vmem:[#allocation2 + $0x14] sm:$0xff] }
 0x163   :  { %3045 = vmatprep.subr.mxu0 %v1340_v46  ;;  %2936 = vmatpush3.msra.mxu1 %v691_v51  ;;  %v1200_v51 = vld [vmem:[%s4235_s5 + $0x1a8] sm:$0xff]  ;;  %v1840_v50 = vmul.f32 %v1823_v25, %v1812_v27 }
 0x164   :  { %3046 = vmatpush3.msra.mxu0 %v1340_v46  ;;  %2937 = vmatprep.subr.mxu1 %v690_v47  ;;  %v1828_v46 = vpop.permute.xlu0 %1827  ;;  %v2095_v25 = vld [vmem:[#allocation2 + $0xc] sm:$0xff] }
 0x165   :  { %3047 = vmatprep.subr.mxu0 %v1339_v2  ;;  %2938 = vmatpush3.msra.mxu1 %v690_v47  ;;  %v1849_v47 = vld [vmem:[%s4235_s5 + $0x2e8] sm:$0xff] }
 0x166   :  { %3048 = vmatpush3.msra.mxu0 %v1339_v2  ;;  %2939 = vmatprep.subr.mxu1 %v689_v49  ;;  %v1589_v2 = vld [vmem:[#allocation2 + $0x58] sm:$0xff] }
 0x167   :  { %3049 = vmatprep.subr.mxu0 %v1338_v52  ;;  %2940 = vmatpush3.msra.mxu1 %v689_v49  ;;  %v1199_v49 = vld [vmem:[%s4235_s5 + $0x1a0] sm:$0xff] }
 0x168   :  { %3050 = vmatpush3.msra.mxu0 %v1338_v52  ;;  %2941 = vmatprep.subr.mxu1 %v688_v56  ;;  %v1191_v52 = vld [vmem:[#allocation2 + $0x20] sm:$0xff] }
 0x169   :  { %3051 = vmatprep.subr.mxu0 %v1337_v57  ;;  %2942 = vmatpush3.msra.mxu1 %v688_v56  ;;  %v1198_v56 = vld [vmem:[%s4235_s5 + $0x198] sm:$0xff] }
 0x16a   :  { %3052 = vmatpush3.msra.mxu0 %v1337_v57  ;;  %2943 = vmatprep.subr.mxu1 %v687_v58  ;;  %v1847_v57 = vld [vmem:[%s4235_s5 + $0x2d8] sm:$0xff] }
 0x16b   :  { %3053 = vmatprep.subr.mxu0 %v1336_v62  ;;  %2944 = vmatpush3.msra.mxu1 %v687_v58  ;;  %v1833_v58 = vpop.permute.xlu0 %1832 }
 0x16c   :  { %3054 = vmatpush3.msra.mxu0 %v1336_v62  ;;  %2946 = vmatmul.mubr.msk.f32.vlgmr.msra.gmra.mxu1 %vm203_vm0, %v684_v30  ;;  %v1196_v62 = vld [vmem:[%s4235_s5 + $0x188] sm:$0xff]  ;;  %v1844_v30 = vld [vmem:[%s4235_s5 + $0x2c0] sm:$0xff] }
 0x16d   :  { %2973 = vmatprep.subr.mxu1 %v976_v5  ;;  %3056 = vmatmul.mubr.msk.f32.vlgmr.msra.gmra.mxu0 %vm203_vm0, %v1333_v6  ;;  %v1484_v6 = vld [vmem:[%s4235_s5 + $0x238] sm:$0xff] }
 0x16e   :  { %3083 = vmatprep.subr.mxu0 %v1597_v59  ;;  %2948 = vmatprep.mubr.msk.f32.mxu1 %vm203_vm0, %v685_v3  ;;  %v1192_v3 = vld [vmem:[#allocation2 + $0x28] sm:$0xff] }
 0x16f   :  { %2974 = vmatpush3.msra.mxu1 %v976_v5  ;;  %3058 = vmatprep.mubr.msk.f32.mxu0 %vm203_vm0, %v1334_v63  ;;  %v1838_v5 = vpop.permute.xlu0 %1837  ;;  %v2133_v63 = vld [vmem:[%s4235_s5 + $0x378] sm:$0xff] }
 0x170   :  { %3084 = vmatpush3.msra.mxu0 %v1597_v59  ;;  %2975 = vmatprep.subr.mxu1 %v975_v33  ;;  %v1841_v59 = vmul.f32 %v1828_v46, %v1813_v4  ;;  %v1706_v4 = vld [vmem:[%s4235_s5 + $0x298] sm:$0xff] }
 0x171   :  { %3085 = vmatprep.subr.mxu0 %v1596_v34  ;;  %2976 = vmatpush3.msra.mxu1 %v975_v33  ;;  %v1842_v33 = vmul.f32 %v1833_v58, %v1814_v37  ;;  %v4110_v37 = vld [vmem:[%s4235_s5 + $0x3d0] sm:$0xff] }
 0x172   :  { %3086 = vmatpush3.msra.mxu0 %v1596_v34  ;;  %2949 = vmatmul.mubr.msk.f32.gmra.mxu1 %vm203_vm0, %v686_v23  ;;  %v1815_v34 = vld [vmem:[#allocation2 + $0x59] sm:$0xff]  ;;  %v1456_v23 = vpop.permute.xlu1 %1455 }
 0x173   :  { %2977 = vmatprep.subr.mxu1 %v974_v7  ;;  %3059 = vmatmul.mubr.msk.f32.gmra.mxu0 %vm203_vm0, %v1335_v9  ;;  %v1843_v9 = vmul.f32 %v1838_v5, %v1815_v34  ;;  %v1705_v5 = vld [vmem:[%s4235_s5 + $0x290] sm:$0xff]  ;;  %v1992_v34 = vld [vmem:[%s4235_s5 + $0x338] sm:$0xff] }
 0x174   :  { %3087 = vmatprep.subr.mxu0 %v1595_v10  ;;  %2978 = vmatpush3.msra.mxu1 %v974_v7  ;;  %v2105_v7 = vpop.permute.xlu0 %2104 }
 0x175   :  { %2989 = vmatprep.mubr.msk.f32.mxu1 %vm203_vm0, %v965_v12  ;;  %3088 = vmatpush3.msra.mxu0 %v1595_v10  ;;  %v2094_v10 = vld [vmem:[#allocation2 + $0x4] sm:$0xff]  ;;  %v1194_v12 = vld [vmem:[#allocation2 + $0x38] sm:$0xff] }
 0x176   :  { %3099 = vmatprep.mubr.msk.f32.mxu0 %vm203_vm0, %v1586_v13  ;;  %2979 = vmatprep.subr.mxu1 %v973_v41  ;;  %v1481_v13 = vld [vmem:[%s4235_s5 + $0x220] sm:$0xff]  ;;  %v1461_v40 = vpop.permute.xlu1 %1460 }
 0x177   :  { %3089 = vmatprep.subr.mxu0 %v1594_v44  ;;  %2980 = vmatpush3.msra.mxu1 %v973_v41  ;;  %v2131_v41 = vld [vmem:[%s4235_s5 + $0x368] sm:$0xff] }
 0x178   :  { %3090 = vmatpush3.msra.mxu0 %v1594_v44  ;;  %2981 = vmatprep.subr.mxu1 %v972_v39  ;;  %v1473_v44 = vmul.f32 %v1456_v23, %v1445_v45  ;;  %v1991_v45 = vld [vmem:[%s4235_s5 + $0x330] sm:$0xff] }
 0x179   :  { %3091 = vmatprep.subr.mxu0 %v1593_v14  ;;  %2982 = vmatpush3.msra.mxu1 %v972_v39  ;;  %v2122_v39 = vmul.f32 %v2105_v7, %v2094_v10  ;;  %v1700_v7 = vld [vmem:[#allocation2 + $0x68] sm:$0xff] }
 0x17a   :  { %3092 = vmatpush3.msra.mxu0 %v1593_v14  ;;  %2983 = vmatprep.subr.mxu1 %v971_v16  ;;  %v2130_v14 = vld [vmem:[%s4235_s5 + $0x360] sm:$0xff]  ;;  %v1466_v21 = vpop.permute.xlu1 %1465  ;;  %v1990_v10 = vld [vmem:[%s4235_s5 + $0x328] sm:$0xff] }
 0x17b   :  { %3093 = vmatprep.subr.mxu0 %v1592_v55  ;;  %2984 = vmatpush3.msra.mxu1 %v971_v16  ;;  %v2110_v16 = vpop.permute.xlu0 %2109 }
 0x17c   :  { %3094 = vmatpush3.msra.mxu0 %v1592_v55  ;;  %2985 = vmatprep.subr.mxu1 %v970_v17  ;;  %v1480_v55 = vld [vmem:[%s4235_s5 + $0x218] sm:$0xff] }
 0x17d   :  { %3095 = vmatprep.subr.mxu0 %v1591_v54  ;;  %2986 = vmatpush3.msra.mxu1 %v970_v17  ;;  %v2129_v17 = vld [vmem:[%s4235_s5 + $0x358] sm:$0xff] }
 0x17e   :  { %3096 = vmatpush3.msra.mxu0 %v1591_v54  ;;  %2987 = vmatprep.subr.mxu1 %v969_v11  ;;  %v1479_v54 = vld [vmem:[%s4235_s5 + $0x210] sm:$0xff] }
 0x17f   :  { %3097 = vmatprep.subr.mxu0 %v1590_v19  ;;  %2988 = vmatpush3.msra.mxu1 %v969_v11  ;;  %v2128_v11 = vld [vmem:[%s4235_s5 + $0x350] sm:$0xff] }
 0x180   :  { %3098 = vmatpush3.msra.mxu0 %v1590_v19  ;;  %2990 = vmatmul.mubr.msk.f32.vlgmr.msra.gmra.mxu1 %vm203_vm0, %v966_v22  ;;  %v2127_v19 = vld [vmem:[%s4235_s5 + $0x348] sm:$0xff]  ;;  %v2115_v22 = vpop.permute.xlu0 %2114 }
 0x181   :  { %3017 = vmatprep.subr.mxu1 %v1202_v24  ;;  %3100 = vmatmul.mubr.msk.f32.vlgmr.msra.gmra.mxu0 %vm203_vm0, %v1587_v48  ;;  %v1447_v48 = vld [vmem:[#allocation2 + $0x6f] sm:$0xff]  ;;  %v2124_v27 = vmul.f32 %v2115_v22, %v2096_v29  ;;  %v2235_v22 = vld [vmem:[#allocation2 + $0x24] sm:$0xff]  ;;  %v2270_v29 = vld [vmem:[%s4235_s5 + $0x398] sm:$0xff] }
 0x182   :  { %3127 = vmatprep.subr.mxu0 %v1851_v26  ;;  %2992 = vmatprep.mubr.msk.f32.mxu1 %vm203_vm0, %v967_v28  ;;  %v1474_v28 = vmul.f32 %v1461_v40, %v1446_v20  ;;  %v1475_v42 = vmul.f32 %v1466_v21, %v1447_v48  ;;  %v1986_v40 = vld [vmem:[%s4235_s5 + $0x308] sm:$0xff]  ;;  %v1956_v20 = vld [vmem:[#allocation2 + $0x3b] sm:$0xff]  ;;  %v2273_v21 = vld [vmem:[%s4235_s5 + $0x3b0] sm:$0xff] }
 0x183   :  { %3018 = vmatpush3.msra.mxu1 %v1202_v24  ;;  %3102 = vmatprep.mubr.msk.f32.mxu0 %vm203_vm0, %v1588_v32  ;;  %v1477_v24 = vld [vmem:[%s4235_s5 + $0x200] sm:$0xff]  ;;  %v2123_v32 = vmul.f32 %v2110_v16, %v2095_v25  ;;  %v2272_v25 = vld [vmem:[%s4235_s5 + $0x3a8] sm:$0xff] }
 0x184   :  { %3128 = vmatpush3.msra.mxu0 %v1851_v26  ;;  %3019 = vmatprep.subr.mxu1 %v1201_v31  ;;  %v2126_v26 = vld [vmem:[%s4235_s5 + $0x340] sm:$0xff]  ;;  %v2120_v46 = vpop.permute.xlu0 %2119 }
 0x185   :  { %3129 = vmatprep.subr.mxu0 %v1850_v38  ;;  %3020 = vmatpush3.msra.mxu1 %v1201_v31  ;;  %v1710_v31 = vld [vmem:[%s4235_s5 + $0x2b8] sm:$0xff] }
 0x186   :  { %3130 = vmatpush3.msra.mxu0 %v1850_v38  ;;  %2993 = vmatmul.mubr.msk.f32.gmra.mxu1 %vm203_vm0, %v968_v43  ;;  %v4054_v38 = vld [vmem:[%s4235_s5 + $0x3f8] sm:$0xff]  ;;  %v1471_v43 = vpop.permute.xlu1 %1470 }
 0x187   :  { %3021 = vmatprep.subr.mxu1 %v1200_v51  ;;  %3103 = vmatmul.mubr.msk.f32.gmra.mxu0 %vm203_vm0, %v1589_v2  ;;  %v2097_v2 = vld [vmem:[#allocation2 + $0x1c] sm:$0xff] }
 0x188   :  { %3131 = vmatprep.subr.mxu0 %v1849_v47  ;;  %3022 = vmatpush3.msra.mxu1 %v1200_v51  ;;  %v1448_v51 = vld [vmem:[#allocation2 + $0x77] sm:$0xff] }
 0x189   :  { %3033 = vmatprep.mubr.msk.f32.mxu1 %vm203_vm0, %v1191_v52  ;;  %3132 = vmatpush3.msra.mxu0 %v1849_v47  ;;  %v1709_v47 = vld [vmem:[%s4235_s5 + $0x2b0] sm:$0xff]  ;;  %v1708_v52 = vld [vmem:[%s4235_s5 + $0x2a8] sm:$0xff] }
 0x18a   :  { %3143 = vmatprep.mubr.msk.f32.mxu0 %vm203_vm0, %v1840_v50  ;;  %3023 = vmatprep.subr.mxu1 %v1199_v49  ;;  %v1476_v50 = vmul.f32 %v1471_v43, %v1448_v51  ;;  %v1964_v58 = vpop.permute.xlu1 %1963  ;;  %v2236_v43 = vld [vmem:[#allocation2 + $0x2c] sm:$0xff]  ;;  %v2267_v51 = vld [vmem:[%s4235_s5 + $0x380] sm:$0xff] }
 0x18b   :  { %3133 = vmatprep.subr.mxu0 %v1848_v53  ;;  %3024 = vmatpush3.msra.mxu1 %v1199_v49  ;;  %v4066_v49 = vld [vmem:[%s4235_s5 + $0x3f0] sm:$0xff] }
 0x18c   :  { %3134 = vmatpush3.msra.mxu0 %v1848_v53  ;;  %3025 = vmatprep.subr.mxu1 %v1198_v56  ;;  %v2125_v53 = vmul.f32 %v2120_v46, %v2097_v2 }
 0x18d   :  { %3135 = vmatprep.subr.mxu0 %v1847_v57  ;;  %3026 = vmatpush3.msra.mxu1 %v1198_v56  ;;  %v2376_v56 = vld [vmem:[#allocation2 + $0x5] sm:$0xff] }
 0x18e   :  { %3136 = vmatpush3.msra.mxu0 %v1847_v57  ;;  %3027 = vmatprep.subr.mxu1 %v1197_v60  ;;  %v4077_v57 = vld [vmem:[%s4235_s5 + $0x3e8] sm:$0xff] }
 0x18f   :  { %3137 = vmatprep.subr.mxu0 %v1846_v61  ;;  %3028 = vmatpush3.msra.mxu1 %v1197_v60  ;;  %v2387_v60 = vpop.permute.xlu0 %2386 }
 0x190   :  { %3138 = vmatpush3.msra.mxu0 %v1846_v61  ;;  %3029 = vmatprep.subr.mxu1 %v1196_v62  ;;  %v1707_v61 = vld [vmem:[%s4235_s5 + $0x2a0] sm:$0xff] }
 0x191   :  { %3139 = vmatprep.subr.mxu0 %v1845_v0  ;;  %3030 = vmatpush3.msra.mxu1 %v1196_v62  ;;  %v2404_v62 = vmul.f32 %v2387_v60, %v2376_v56 }
 0x192   :  { %3140 = vmatpush3.msra.mxu0 %v1845_v0  ;;  %3031 = vmatprep.subr.mxu1 %v1195_v1  ;;  %v1699_v0 = vld [vmem:[#allocation2 + $0x60] sm:$0xff] }
 0x193   :  { %3141 = vmatprep.subr.mxu0 %v1844_v30  ;;  %3032 = vmatpush3.msra.mxu1 %v1195_v1  ;;  %v4089_v1 = vld [vmem:[%s4235_s5 + $0x3e0] sm:$0xff] }
 0x194   :  { %3142 = vmatpush3.msra.mxu0 %v1844_v30  ;;  %3034 = vmatmul.mubr.msk.f32.vlgmr.msra.gmra.mxu1 %vm203_vm0, %v1192_v3  ;;  %v4100_v30 = vld [vmem:[%s4235_s5 + $0x3d8] sm:$0xff]  ;;  %v4120_v3 = vld [vmem:[%s4235_s5 + $0x3c8] sm:$0xff] }
 0x195   :  { %3061 = vmatprep.subr.mxu1 %v1484_v6  ;;  %3144 = vmatmul.mubr.msk.f32.vlgmr.msra.gmra.mxu0 %vm203_vm0, %v1841_v59  ;;  %v1704_v59 = vld [vmem:[%s4235_s5 + $0x288] sm:$0xff] }
 0x196   :  { %3171 = vmatprep.subr.mxu0 %v2133_v63  ;;  %3036 = vmatprep.mubr.msk.f32.mxu1 %vm203_vm0, %v1193_v36  ;;  %v4130_v36 = vld [vmem:[%s4235_s5 + $0x3c0] sm:$0xff] }
 0x197   :  { %3062 = vmatpush3.msra.mxu1 %v1484_v6  ;;  %3146 = vmatprep.mubr.msk.f32.mxu0 %vm203_vm0, %v1842_v33  ;;  %v1969_v6 = vpop.permute.xlu1 %1968  ;;  %v2377_v33 = vld [vmem:[#allocation2 + $0xd] sm:$0xff] }
 0x198   :  { %3172 = vmatpush3.msra.mxu0 %v2133_v63  ;;  %3063 = vmatprep.subr.mxu1 %v1483_v35  ;;  %v1703_v63 = vld [vmem:[%s4235_s5 + $0x280] sm:$0xff] }
 0x199   :  { %3173 = vmatprep.subr.mxu0 %v2132_v18  ;;  %3064 = vmatpush3.msra.mxu1 %v1483_v35  ;;  %v2392_v35 = vpop.permute.xlu0 %2391 }
 0x19a   :  { %3174 = vmatpush3.msra.mxu0 %v2132_v18  ;;  %3037 = vmatmul.mubr.msk.f32.gmra.mxu1 %vm203_vm0, %v1194_v12  ;;  %v2405_v23 = vmul.f32 %v2392_v35, %v2377_v33 }
 0x19b   :  { %3065 = vmatprep.subr.mxu1 %v1482_v8  ;;  %3147 = vmatmul.mubr.msk.f32.gmra.mxu0 %vm203_vm0, %v1843_v9  ;;  %v1974_v18 = vpop.permute.xlu1 %1973  ;;  %v1701_v9 = vld [vmem:[#allocation2 + $0x70] sm:$0xff] }
 0x19c   :  { %3175 = vmatprep.subr.mxu0 %v2131_v41  ;;  %3066 = vmatpush3.msra.mxu1 %v1482_v8  ;;  %v1953_v8 = vld [vmem:[#allocation2 + $0x23] sm:$0xff] }
 0x19d   :  { %3077 = vmatprep.mubr.msk.f32.mxu1 %vm203_vm0, %v1473_v44  ;;  %3176 = vmatpush3.msra.mxu0 %v2131_v41  ;;  %v1981_v12 = vmul.f32 %v1964_v58, %v1953_v8  ;;  %v1702_v41 = vld [vmem:[#allocation2 + $0x78] sm:$0xff]  ;;  %v1989_v44 = vld [vmem:[%s4235_s5 + $0x320] sm:$0xff] }
 0x19e   :  { %3187 = vmatprep.mubr.msk.f32.mxu0 %vm203_vm0, %v2122_v39  ;;  %3067 = vmatprep.subr.mxu1 %v1481_v13  ;;  %v1988_v39 = vld [vmem:[%s4235_s5 + $0x318] sm:$0xff] }
 0x19f   :  { %3177 = vmatprep.subr.mxu0 %v2130_v14  ;;  %3068 = vmatpush3.msra.mxu1 %v1481_v13  ;;  %v1979_v13 = vpop.permute.xlu1 %1978 }
 0x1a0   :  { %3178 = vmatpush3.msra.mxu0 %v2130_v14  ;;  %3069 = vmatprep.subr.mxu1 %v1480_v55  ;;  %v1987_v14 = vld [vmem:[%s4235_s5 + $0x310] sm:$0xff] }
 0x1a1   :  { %3179 = vmatprep.subr.mxu0 %v2129_v17  ;;  %3070 = vmatpush3.msra.mxu1 %v1480_v55  ;;  %v1954_v55 = vld [vmem:[#allocation2 + $0x2b] sm:$0xff] }
 0x1a2   :  { %3180 = vmatpush3.msra.mxu0 %v2129_v17  ;;  %3071 = vmatprep.subr.mxu1 %v1479_v54  ;;  %v1985_v17 = vld [vmem:[%s4235_s5 + $0x300] sm:$0xff] }
 0x1a3   :  { %3181 = vmatprep.subr.mxu0 %v2128_v11  ;;  %3072 = vmatpush3.msra.mxu1 %v1479_v54  ;;  %v2246_v16 = vpop.permute.xlu1 %2245  ;;  %v1955_v54 = vld [vmem:[#allocation2 + $0x33] sm:$0xff] }
 0x1a4   :  { %3182 = vmatpush3.msra.mxu0 %v2128_v11  ;;  %3073 = vmatprep.subr.mxu1 %v1478_v15  ;;  %v2274_v11 = vld [vmem:[%s4235_s5 + $0x3b8] sm:$0xff]  ;;  %v2263_v48 = vmul.f32 %v2246_v16, %v2235_v22 }
 0x1a5   :  { %3183 = vmatprep.subr.mxu0 %v2127_v19  ;;  %3074 = vmatpush3.msra.mxu1 %v1478_v15  ;;  %v1982_v15 = vmul.f32 %v1969_v6, %v1954_v55 }
 0x1a6   :  { %3184 = vmatpush3.msra.mxu0 %v2127_v19  ;;  %3075 = vmatprep.subr.mxu1 %v1477_v24  ;;  %v1983_v19 = vmul.f32 %v1974_v18, %v1955_v54 }
 0x1a7   :  { %3185 = vmatprep.subr.mxu0 %v2126_v26  ;;  %3076 = vmatpush3.msra.mxu1 %v1477_v24  ;;  %v2251_v24 = vpop.permute.xlu1 %2250 }
 0x1a8   :  { %3186 = vmatpush3.msra.mxu0 %v2126_v26  ;;  %3078 = vmatmul.mubr.msk.f32.vlgmr.msra.gmra.mxu1 %vm203_vm0, %v1474_v28  ;;  %v1984_v26 = vmul.f32 %v1979_v13, %v1956_v20  ;;  %v2271_v28 = vld [vmem:[%s4235_s5 + $0x3a0] sm:$0xff] }
 0x1a9   :  { %3105 = vmatprep.subr.mxu1 %v1710_v31  ;;  %3188 = vmatmul.mubr.msk.f32.vlgmr.msra.gmra.mxu0 %vm203_vm0, %v2123_v32  ;;  %v2269_v32 = vld [vmem:[%s4235_s5 + $0x390] sm:$0xff] }
 0x1aa   :  { %3215 = vmatprep.subr.mxu0 %v4054_v38  ;;  %3080 = vmatprep.mubr.msk.f32.mxu1 %vm203_vm0, %v1475_v42  ;;  %v2268_v42 = vld [vmem:[%s4235_s5 + $0x388] sm:$0xff] }
 0x1ab   :  { %3106 = vmatpush3.msra.mxu1 %v1710_v31  ;;  %3190 = vmatprep.mubr.msk.f32.mxu0 %vm203_vm0, %v2124_v27  ;;  %v2256_v31 = vpop.permute.xlu1 %2255  ;;  %v2237_v27 = vld [vmem:[#allocation2 + $0x34] sm:$0xff] }
 0x1ac   :  { %3216 = vmatpush3.msra.mxu0 %v4054_v38  ;;  %3107 = vmatprep.subr.mxu1 %v1709_v47  ;;  %v2265_v2 = vmul.f32 %v2256_v31, %v2237_v27 }
 0x1ad   :  { %3217 = vmatprep.subr.mxu0 %v4066_v49  ;;  %3108 = vmatpush3.msra.mxu1 %v1709_v47  ;;  %v2264_v47 = vmul.f32 %v2251_v24, %v2236_v43 }
 0x1ae   :  { %3218 = vmatpush3.msra.mxu0 %v4066_v49  ;;  %3081 = vmatmul.mubr.msk.f32.gmra.mxu1 %vm203_vm0, %v1476_v50  ;;  %v2378_v50 = vld [vmem:[#allocation2 + $0x15] sm:$0xff] }
 0x1af   :  { %3109 = vmatprep.subr.mxu1 %v1708_v52  ;;  %3191 = vmatmul.mubr.msk.f32.gmra.mxu0 %vm203_vm0, %v2125_v53  ;;  %v2261_v46 = vpop.permute.xlu1 %2260 }
 0x1b0   :  { %3219 = vmatprep.subr.mxu0 %v4077_v57  ;;  %3110 = vmatpush3.msra.mxu1 %v1708_v52  ;;  %v3266_v52 = vld [vmem:[#allocation2 + $0x3c] sm:$0xff] }
 0x1b1   :  { %3121 = vmatprep.mubr.msk.f32.mxu1 %vm203_vm0, %v1699_v0  ;;  %3220 = vmatpush3.msra.mxu0 %v4077_v57  ;;  %v2266_v53 = vmul.f32 %v3266_v52, %v2261_v46 }
 0x1b2   :  { %3231 = vmatprep.mubr.msk.f32.mxu0 %vm203_vm0, %v2404_v62  ;;  %3111 = vmatprep.subr.mxu1 %v1707_v61 }
 0x1b3   :  { %3221 = vmatprep.subr.mxu0 %v4089_v1  ;;  %3112 = vmatpush3.msra.mxu1 %v1707_v61  ;;  %v2397_v56 = vpop.permute.xlu1 %2396 }
 0x1b4   :  { %3222 = vmatpush3.msra.mxu0 %v4089_v1  ;;  %3113 = vmatprep.subr.mxu1 %v1706_v4  ;;  %v2406_v58 = vmul.f32 %v2397_v56, %v2378_v50 }
 0x1b5   :  { %3223 = vmatprep.subr.mxu0 %v4100_v30  ;;  %3114 = vmatpush3.msra.mxu1 %v1706_v4 }
 0x1b6   :  { %3224 = vmatpush3.msra.mxu0 %v4100_v30  ;;  %3115 = vmatprep.subr.mxu1 %v1705_v5 }
 0x1b7   :  { %3225 = vmatprep.subr.mxu0 %v4110_v37  ;;  %3116 = vmatpush3.msra.mxu1 %v1705_v5 }
 0x1b8   :  { %3226 = vmatpush3.msra.mxu0 %v4110_v37  ;;  %3117 = vmatprep.subr.mxu1 %v1704_v59 }
 0x1b9   :  { %3227 = vmatprep.subr.mxu0 %v4120_v3  ;;  %3118 = vmatpush3.msra.mxu1 %v1704_v59 }
 0x1ba   :  { %3228 = vmatpush3.msra.mxu0 %v4120_v3  ;;  %3119 = vmatprep.subr.mxu1 %v1703_v63 }
 0x1bb   :  { %3229 = vmatprep.subr.mxu0 %v4130_v36  ;;  %3120 = vmatpush3.msra.mxu1 %v1703_v63 }
 0x1bc   :  { %3230 = vmatpush3.msra.mxu0 %v4130_v36  ;;  %3122 = vmatmul.mubr.msk.f32.vlgmr.msra.gmra.mxu1 %vm203_vm0, %v1700_v7 }
 0x1bd   :  { %3149 = vmatprep.subr.mxu1 %v1992_v34  ;;  %3232 = vmatmul.mubr.msk.f32.vlgmr.msra.gmra.mxu0 %vm203_vm0, %v2405_v23 }
 0x1be   :  { %3124 = vmatprep.mubr.msk.f32.mxu1 %vm203_vm0, %v1701_v9  ;;  %3150 = vmatpush3.msra.mxu1 %v1992_v34 }
 0x1bf   :  { %3151 = vmatprep.subr.mxu1 %v1991_v45 }
 0x1c0   :  { %3152 = vmatpush3.msra.mxu1 %v1991_v45 }
 0x1c1   :  { %3125 = vmatmul.mubr.msk.f32.gmra.mxu1 %vm203_vm0, %v1702_v41  ;;  %3153 = vmatprep.subr.mxu1 %v1990_v10 }
 0x1c2   :  { %3154 = vmatpush3.msra.mxu1 %v1990_v10  ;;  %3165 = vmatprep.mubr.msk.f32.mxu1 %vm203_vm0, %v1981_v12 }
 0x1c3   :  { %3155 = vmatprep.subr.mxu1 %v1989_v44 }
 0x1c4   :  { %3156 = vmatpush3.msra.mxu1 %v1989_v44 }
 0x1c5   :  { %3157 = vmatprep.subr.mxu1 %v1988_v39 }
 0x1c6   :  { %3158 = vmatpush3.msra.mxu1 %v1988_v39 }
 0x1c7   :  { %3159 = vmatprep.subr.mxu1 %v1987_v14 }
 0x1c8   :  { %3160 = vmatpush3.msra.mxu1 %v1987_v14 }
 0x1c9   :  { %3161 = vmatprep.subr.mxu1 %v1986_v40 }
 0x1ca   :  { %3162 = vmatpush3.msra.mxu1 %v1986_v40 }
 0x1cb   :  { %3163 = vmatprep.subr.mxu1 %v1985_v17 }
 0x1cc   :  { %3164 = vmatpush3.msra.mxu1 %v1985_v17 }
 0x1cd   :  { %3166 = vmatmul.mubr.msk.f32.vlgmr.msra.gmra.mxu1 %vm203_vm0, %v1982_v15  ;;  %3193 = vmatprep.subr.mxu1 %v2274_v11 }
 0x1ce   :  { %3168 = vmatprep.mubr.msk.f32.mxu1 %vm203_vm0, %v1983_v19  ;;  %3194 = vmatpush3.msra.mxu1 %v2274_v11 }
 0x1cf   :  { %3195 = vmatprep.subr.mxu1 %v2273_v21 }
 0x1d0   :  { %3196 = vmatpush3.msra.mxu1 %v2273_v21 }
 0x1d1   :  { %3169 = vmatmul.mubr.msk.f32.gmra.mxu1 %vm203_vm0, %v1984_v26  ;;  %3197 = vmatprep.subr.mxu1 %v2272_v25 }
 0x1d2   :  { %3198 = vmatpush3.msra.mxu1 %v2272_v25  ;;  %3209 = vmatprep.mubr.msk.f32.mxu1 %vm203_vm0, %v2263_v48 }
 0x1d3   :  { %3199 = vmatprep.subr.mxu1 %v2271_v28 }
 0x1d4   :  { %3200 = vmatpush3.msra.mxu1 %v2271_v28 }
 0x1d5   :  { %3201 = vmatprep.subr.mxu1 %v2270_v29 }
 0x1d6   :  { %3202 = vmatpush3.msra.mxu1 %v2270_v29 }
 0x1d7   :  { %3203 = vmatprep.subr.mxu1 %v2269_v32 }
 0x1d8   :  { %3204 = vmatpush3.msra.mxu1 %v2269_v32 }
 0x1d9   :  { %3205 = vmatprep.subr.mxu1 %v2268_v42 }
 0x1da   :  { %3206 = vmatpush3.msra.mxu1 %v2268_v42 }
 0x1db   :  { %3207 = vmatprep.subr.mxu1 %v2267_v51 }
 0x1dc   :  { %3208 = vmatpush3.msra.mxu1 %v2267_v51 }
 0x1dd   :  { %3210 = vmatmul.mubr.msk.f32.vlgmr.msra.gmra.mxu1 %vm203_vm0, %v2264_v47  ;;  %3237 = vmatprep.subr.mxu1 %v4054_v38 }
 0x1de   :  { %3212 = vmatprep.mubr.msk.f32.mxu1 %vm203_vm0, %v2265_v2  ;;  %3245 = vmatpush3.msra.mxu1 %v4054_v38  ;;  %v2402_v38 = vpop.permute.xlu1 %2401 }
 0x1df   :  { %3238 = vmatprep.subr.mxu1 %v4066_v49 }
 0x1e0   :  { %3246 = vmatpush3.msra.mxu1 %v4066_v49  ;;  %v2379_v49 = vld [vmem:[#allocation2 + $0x1d] sm:$0xff] }
 0x1e1   :  { %3213 = vmatmul.mubr.msk.f32.gmra.mxu1 %vm203_vm0, %v2266_v53  ;;  %3239 = vmatprep.subr.mxu1 %v4077_v57 }
 0x1e2   :  { %3247 = vmatpush3.msra.mxu1 %v4077_v57  ;;  %3234 = vmatprep.mubr.msk.f32.mxu1 %vm203_vm0, %v2406_v58  ;;  %v2407_v57 = vmul.f32 %v2402_v38, %v2379_v49 }
 0x1e3   :  { %3240 = vmatprep.subr.mxu1 %v4089_v1 }
 0x1e4   :  { %3248 = vmatpush3.msra.mxu1 %v4089_v1 }
 0x1e5   :  { %3241 = vmatprep.subr.mxu1 %v4100_v30 }
 0x1e6   :  { %3249 = vmatpush3.msra.mxu1 %v4100_v30 }
 0x1e7   :  { %3242 = vmatprep.subr.mxu1 %v4110_v37 }
 0x1e8   :  { %3250 = vmatpush3.msra.mxu1 %v4110_v37 }
 0x1e9   :  { %3243 = vmatprep.subr.mxu1 %v4120_v3 }
 0x1ea   :  { %3251 = vmatpush3.msra.mxu1 %v4120_v3 }
 0x1eb   :  { %3244 = vmatprep.subr.mxu1 %v4130_v36 }
 0x1ec   :  { %3252 = vmatpush3.msra.mxu1 %v4130_v36 }
 0x1ed   :  { %3235 = vmatmul.mubr.msk.f32.vlgmr.msra.gmra.mxu1 %vm203_vm0, %v2407_v57 }
 0x205   :  { %v2903_v60 = vpop.f32.mrf.mxu1 }
 0x206   :  { %v2969_v37 = vpop.f32.mrf.mxu0 }
 0x207   :  { %v539_v61 = vpop.f32.mrf.mxu1 }
 0x208   :  { %v914_v59 = vpop.f32.mrf.mxu0 }
 0x20b   :  { %v2906_v62 = vpop.f32.mrf.mxu1 }
 0x20c   :  { %v2972_v3 = vpop.f32.mrf.mxu0 }
 0x20d   :  { %v549_v0 = vpop.f32.mrf.mxu1 }
 0x20e   :  { %v924_v35 = vpop.f32.mrf.mxu0 }
 0x218   :  { %v2925_v1 = vpop.f32.mrf.mxu1 }
 0x219   :  { %v3013_v18 = vpop.f32.mrf.mxu0  ;;  %v642_v15 = vadd.f32 %v2925_v1, %v2903_v60 }
 0x21a   :  { %v636_v4 = vpop.f32.mrf.mxu1 }
 0x21b   :  { %v1168_v23 = vpop.f32.mrf.mxu0  ;;  %v637_v19 = vadd.f32 %v636_v4, %v539_v61 }
 0x21e   :  { %v2928_v30 = vpop.f32.mrf.mxu1 }
 0x21f   :  { %v3016_v45 = vpop.f32.mrf.mxu0  ;;  %v652_v46 = vadd.f32 %v2928_v30, %v2906_v62 }
 0x220   :  { %v646_v5 = vpop.f32.mrf.mxu1 }
 0x221   :  { %v1178_v9 = vpop.f32.mrf.mxu0  ;;  %v647_v50 = vadd.f32 %v646_v5, %v549_v0 }
 0x22c   :  { %v2947_v6 = vpop.f32.mrf.mxu1 }
 0x22d   :  { %v3057_v12 = vpop.f32.mrf.mxu0  ;;  %v793_v20 = vadd.f32 %v2947_v6, %v642_v15 }
 0x22e   :  { %v773_v63 = vpop.f32.mrf.mxu1 }
 0x22f   :  { %v1422_v44 = vpop.f32.mrf.mxu0  ;;  %v792_v24 = vadd.f32 %v773_v63, %v637_v19  ;;  %v934_v25 = vadd.f32 %v2969_v37, %v793_v20 }
 0x231   :  { %v933_v29 = vadd.f32 %v914_v59, %v792_v24 }
 0x232   :  { %v2950_v33 = vpop.f32.mrf.mxu1 }
 0x233   :  { %v3060_v39 = vpop.f32.mrf.mxu0  ;;  %v795_v52 = vadd.f32 %v2950_v33, %v652_v46 }
 0x234   :  { %v783_v34 = vpop.f32.mrf.mxu1 }
 0x235   :  { %v1432_v40 = vpop.f32.mrf.mxu0  ;;  %v794_v38 = vadd.f32 %v783_v34, %v647_v50  ;;  %v936_v57 = vadd.f32 %v2972_v3, %v795_v52 }
 0x237   :  { %v935_v6 = vadd.f32 %v924_v35, %v794_v38 }
 0x240   :  { %v2991_v36 = vpop.f32.mrf.mxu1 }
 0x241   :  { %v3101_v55 = vpop.f32.mrf.mxu0  ;;  %v1075_v28 = vadd.f32 %v2991_v36, %v934_v25 }
 0x242   :  { %v1055_v7 = vpop.f32.mrf.mxu1 }
 0x243   :  { %v1676_v54 = vpop.f32.mrf.mxu0  ;;  %v1074_v42 = vadd.f32 %v1055_v7, %v933_v29  ;;  %v1188_v43 = vadd.f32 %v3013_v18, %v1075_v28 }
 0x245   :  { %v1187_v2 = vadd.f32 %v1168_v23, %v1074_v42 }
 0x246   :  { %v2994_v8 = vpop.f32.mrf.mxu1 }
 0x247   :  { %v3104_v21 = vpop.f32.mrf.mxu0  ;;  %v1077_v37 = vadd.f32 %v2994_v8, %v936_v57 }
 0x248   :  { %v1065_v10 = vpop.f32.mrf.mxu1 }
 0x249   :  { %v4214_v26 = vpop.f32.mrf.mxu0  ;;  %v1076_v62 = vadd.f32 %v1065_v10, %v935_v6  ;;  %v1190_v36 = vadd.f32 %v3016_v45, %v1077_v37 }
 0x24b   :  { %v1189_v34 = vadd.f32 %v1178_v9, %v1076_v62 }
 0x254   :  { %v3035_v41 = vpop.f32.mrf.mxu1 }
 0x255   :  { %v3145_v31 = vpop.f32.mrf.mxu0  ;;  %v1301_v47 = vadd.f32 %v3035_v41, %v1188_v43 }
 0x256   :  { %v1281_v13 = vpop.f32.mrf.mxu1 }
 0x257   :  { %v1930_v51 = vpop.f32.mrf.mxu0  ;;  %v1300_v53 = vadd.f32 %v1281_v13, %v1187_v2  ;;  %v1442_v49 = vadd.f32 %v3057_v12, %v1301_v47 }
 0x259   :  { %v1441_v61 = vadd.f32 %v1422_v44, %v1300_v53 }
 0x25a   :  { %v3038_v14 = vpop.f32.mrf.mxu1 }
 0x25b   :  { %v3148_v56 = vpop.f32.mrf.mxu0  ;;  %v1303_v7 = vadd.f32 %v3038_v14, %v1190_v36 }
 0x25c   :  { %v1291_v16 = vpop.f32.mrf.mxu1 }
 0x25d   :  { %v1940_v1 = vpop.f32.mrf.mxu0  ;;  %v1302_v3 = vadd.f32 %v1291_v16, %v1189_v34  ;;  %v2604_v16 = vld [vmem:[%s4238_s6] ss:$0 sm:$0xff] }
 0x25f   :  { %v1443_v15 = vadd.f32 %v1432_v40, %v1302_v3 }
 0x268   :  { %v3079_v17 = vpop.f32.mrf.mxu1 }
 0x269   :  { %v1583_v60 = vadd.f32 %v3079_v17, %v1442_v49  ;;  %v3189_v63 = vpop.f32.mrf.mxu0  ;;  %v1444_v17 = vadd.f32 %v3060_v39, %v1303_v7 }
 0x26a   :  { %v1563_v11 = vpop.f32.mrf.mxu1 }
 0x26b   :  { %v1582_v59 = vadd.f32 %v1563_v11, %v1441_v61  ;;  %v1696_v30 = vadd.f32 %v3101_v55, %v1583_v60  ;;  %v2212_v33 = vpop.f32.mrf.mxu0 }
 0x26d   :  { %v1695_v5 = vadd.f32 %v1676_v54, %v1582_v59 }
 0x26e   :  { %v3082_v22 = vpop.f32.mrf.mxu1 }
 0x26f   :  { %v3192_v44 = vpop.f32.mrf.mxu0  ;;  %v1585_v11 = vadd.f32 %v3082_v22, %v1444_v17 }
 0x270   :  { %v1573_v48 = vpop.f32.mrf.mxu1 }
 0x271   :  { %v2222_v10 = vpop.f32.mrf.mxu0  ;;  %v1584_v45 = vadd.f32 %v1573_v48, %v1443_v15  ;;  %v1698_v25 = vadd.f32 %v3104_v21, %v1585_v11 }
 0x273   :  { %v1697_v29 = vadd.f32 %v4214_v26, %v1584_v45 }
 0x27c   :  { %v3123_v32 = vpop.f32.mrf.mxu1 }
 0x27d   :  { %v1809_v0 = vadd.f32 %v3123_v32, %v1696_v30  ;;  %v3233_v54 = vpop.f32.mrf.mxu0 }
 0x27e   :  { %v1789_v27 = vpop.f32.mrf.mxu1 }
 0x27f   :  { %v1808_v12 = vadd.f32 %v1789_v27, %v1695_v5  ;;  %v1950_v41 = vadd.f32 %v3145_v31, %v1809_v0  ;;  %v2494_v31 = vpop.f32.mrf.mxu0 }
 0x281   :  { %v3126_v58 = vpop.f32.mrf.mxu1  ;;  %v1949_v35 = vadd.f32 %v1930_v51, %v1808_v12 }
 0x282   :  { %v1811_v39 = vadd.f32 %v3126_v58, %v1698_v25 }
 0x283   :  { %v1799_v4 = vpop.f32.mrf.mxu1 }
 0x284   :  { %v1810_v32 = vadd.f32 %v1799_v4, %v1697_v29  ;;  %v1952_v43 = vadd.f32 %v3148_v56, %v1811_v39 }
 0x286   :  { %v1951_v27 = vadd.f32 %v1940_v1, %v1810_v32 }
 0x28d   :  { %v3167_v18 = vpop.f32.mrf.mxu1 }
 0x28e   :  { %v2091_v8 = vadd.f32 %v3167_v18, %v1950_v41 }
 0x28f   :  { %v2071_v23 = vpop.f32.mrf.mxu1 }
 0x290   :  { %v2090_v19 = vadd.f32 %v2071_v23, %v1949_v35  ;;  %v2232_v20 = vadd.f32 %v3189_v63, %v2091_v8 }
 0x291   :  { %v3170_v13 = vpop.f32.mrf.mxu1 }
 0x292   :  { %v2231_v9 = vadd.f32 %v2212_v33, %v2090_v19  ;;  %v2093_v21 = vadd.f32 %v3170_v13, %v1952_v43 }
 0x293   :  { %v2081_v55 = vpop.f32.mrf.mxu1 }
 0x294   :  { %v2092_v47 = vadd.f32 %v2081_v55, %v1951_v27  ;;  %v2234_v2 = vadd.f32 %v3192_v44, %v2093_v21 }
 0x296   :  { %v2233_v53 = vadd.f32 %v2222_v10, %v2092_v47 }
 0x29d   :  { %v3211_v24 = vpop.f32.mrf.mxu1 }
 0x29e   :  { %v2373_v14 = vadd.f32 %v3211_v24, %v2232_v20 }
 0x29f   :  { %v2353_v28 = vpop.f32.mrf.mxu1 }
 0x2a0   :  { %v2514_v22 = vadd.f32 %v3233_v54, %v2373_v14  ;;  %v2372_v40 = vadd.f32 %v2353_v28, %v2231_v9 }
 0x2a1   :  { %v3214_v46 = vpop.f32.mrf.mxu1 }
 0x2a2   :  { %v2525_v42 = vadd.f32 %v2604_v16, %v2514_v22  ;;  %v2513_v48 = vadd.f32 %v2494_v31, %v2372_v40  ;;  %v2375_v52 = vadd.f32 %v3214_v46, %v2234_v2 }
 0x2a3   :  { %v2363_v50 = vpop.f32.mrf.mxu1 }
 0x2a4   :  { %3258 = vtanh.f32 %v2525_v42  ;;  %v2524_v51 = vadd.f32 %v2604_v16, %v2513_v48  ;;  %v2374_v26 = vadd.f32 %v2363_v50, %v2233_v53 }
 0x2a6   :  { %3260 = vtanh.f32 %v2524_v51 }
 0x2ad   :  { %v3236_v58 = vpop.f32.mrf.mxu1 }
 0x2ae   :  { %v2516_v38 = vadd.f32 %v3236_v58, %v2375_v52 }
 0x2af   :  { %v2504_v49 = vpop.f32.mrf.mxu1 }
 0x2b0   :  { %v2527_v57 = vadd.f32 %v2604_v16, %v2516_v38  ;;  %v2515_v60 = vadd.f32 %v2504_v49, %v2374_v26 }
 0x2b1   :  { %v3259_v61 = vpop.eup %3258 }
 0x2b2   :  { %2533 = vst [vmem:[%s4239_s7 + $0x8] sm:$0xff] %v3259_v61  ;;  %3262 = vtanh.f32 %v2527_v57  ;;  %v2526_v56 = vadd.f32 %v2604_v16, %v2515_v60 }
 0x2b3   :  { %v3261_v1 = vpop.eup %3260 }
 0x2b4   :  { %2532 = vst [vmem:[%s4239_s7] sm:$0xff] %v3261_v1  ;;  %3264 = vtanh.f32 %v2526_v56 }
 0x2bf   :  { %v3263_v4 = vpop.eup %3262 }
 0x2c0   :  { %2535 = vst [vmem:[%s4239_s7 + $0x18] sm:$0xff] %v3263_v4 }
 0x2c1   :  { %v3265_v37 = vpop.eup %3264 }
 0x2c2   :  { %2534 = vst [vmem:[%s4239_s7 + $0x10] sm:$0xff] %v3265_v37 }

</bundles_post_ra>
